<compile_context>
chip_gen: v5e
topology: v5e:2x2
jax: 0.10.0
libtpu: 0.0.40
codegen_flags: <defaults>
</compile_context>

<pallas_src>
import jax
import jax.numpy as jnp
from jax import lax
from jax.experimental import pallas as pl
from jax.experimental.pallas import tpu as pltpu


def encoder_kernel(ids_ref, emb_ref, wih_ref, bias_ref, whh_ref,
                   hout_ref, cout_ref, table_ref, xp_ref):
    """Fused Embedding + input projection + serial LSTM recurrence.

    ids_ref : (B, T) int32 token ids, SMEM.
    emb_ref : (V_pad, H)  f32 embedding table (zero-padded rows), VMEM.
    wih_ref : (H, 4H)     f32 W_ih^T, VMEM.
    bias_ref: (1, 4H)     f32 (b_ih + b_hh), VMEM.
    whh_ref : (H, 4H)     bf16 W_hh^T, VMEM (MXU-native dtype, f32 accumulation).
    hout_ref/cout_ref: (B, H) f32 final hidden / cell state.
    table_ref: (V_pad, 4H) f32 scratch — projected vocab table.
    xp_ref   : (T, B, 4H)  f32 scratch — per-step pre-projected inputs.
    """
    T, B, _ = xp_ref.shape
    H = whh_ref.shape[0]

    # ---------- Preamble: fused embedding gather + input projection ----------
    # Project every vocab row through W_ih once (one tiny MXU matmul); this is
    # cheaper than projecting T*B gathered rows and keeps everything on-chip.
    table_ref[...] = (
        jnp.dot(emb_ref[...], wih_ref[...], preferred_element_type=jnp.float32)
        + bias_ref[...]
    )

    # Gather the per-(t, b) pre-projected inputs using the SMEM token ids.
    # Dynamic row loads from the VMEM table; static (t, b) destinations.
    for t in range(T):
        for b in range(B):
            tok = ids_ref[b, t]                       # scalar from SMEM
            row = table_ref[pl.ds(tok, 1), :]         # (1, 4H) dynamic row gather
            xp_ref[t, b:b + 1, :] = row

    # ---------- Serial recurrence ----------
    whh = whh_ref[...]   # (H, 4H) bf16; loaded once, reused across unrolled loop

    def sigmoid(z):
        # Single EUP op per sigmoid (tanh-based); math stays in f32 (v5e-safe).
        return 0.5 * jnp.tanh(0.5 * z) + 0.5

    def step(t, carry):
        h, c = carry
        # Only the recurrent matmul sits on the serial critical path; bf16
        # operands with f32 accumulation halve MXU weight-push work per step.
        gates = xp_ref[t] + jnp.dot(h.astype(jnp.bfloat16), whh,
                                    preferred_element_type=jnp.float32)
        # PyTorch LSTM gate order: input, forget, cell(g), output.
        i_g = sigmoid(gates[:, 0 * H:1 * H])
        f_g = sigmoid(gates[:, 1 * H:2 * H])
        g_g = jnp.tanh(gates[:, 2 * H:3 * H])
        o_g = sigmoid(gates[:, 3 * H:4 * H])
        c_new = f_g * c + i_g * g_g
        h_new = o_g * jnp.tanh(c_new)
        return (h_new, c_new)

    h0 = jnp.zeros((B, H), jnp.float32)   # PyTorch default zero initial state
    c0 = jnp.zeros((B, H), jnp.float32)
    h, c = lax.fori_loop(0, T, step, (h0, c0), unroll=True)

    hout_ref[...] = h.astype(hout_ref.dtype)
    cout_ref[...] = c.astype(cout_ref.dtype)


def encoder_forward(x, params):
    """Pallas forward pass matching Encoder.forward semantics: x -> (hidden, cell)."""
    emb_w, w_ih, w_hh, b_ih, b_hh = params
    B, T = x.shape
    V, H = emb_w.shape
    G = 4 * H

    # Weight prep (constant across calls): pad the vocab axis to a sublane
    # multiple so the in-kernel table matmul LHS is (8k, H)-aligned; transpose
    # the LSTM weights so the kernel's matmuls are plain row-major dots.
    V_pad = ((V + 7) // 8) * 8
    emb_pad = jnp.zeros((V_pad, H), jnp.float32).at[:V].set(emb_w.astype(jnp.float32))
    w_ih_t = w_ih.T.astype(jnp.float32)                       # (H, 4H)
    w_hh_t = w_hh.T.astype(jnp.bfloat16)                      # (H, 4H), bf16 weights
    bias = (b_ih + b_hh).astype(jnp.float32)[None, :]         # (1, 4H)
    ids = x.astype(jnp.int32)                                 # (B, T)

    h_out, c_out = pl.pallas_call(
        encoder_kernel,
        out_shape=(jax.ShapeDtypeStruct((B, H), jnp.float32),
                   jax.ShapeDtypeStruct((B, H), jnp.float32)),
        in_specs=[
            pl.BlockSpec(memory_space=pltpu.MemorySpace.SMEM),   # token ids
            pl.BlockSpec(memory_space=pltpu.MemorySpace.VMEM),   # embedding table
            pl.BlockSpec(memory_space=pltpu.MemorySpace.VMEM),   # W_ih^T
            pl.BlockSpec(memory_space=pltpu.MemorySpace.VMEM),   # fused bias
            pl.BlockSpec(memory_space=pltpu.MemorySpace.VMEM),   # W_hh^T (bf16)
        ],
        out_specs=(pl.BlockSpec(memory_space=pltpu.MemorySpace.VMEM),
                   pl.BlockSpec(memory_space=pltpu.MemorySpace.VMEM)),
        scratch_shapes=[
            pltpu.VMEM((V_pad, G), jnp.float32),   # projected vocab table
            pltpu.VMEM((T, B, G), jnp.float32),    # per-step pre-projected inputs
        ],
    )(ids, emb_pad, w_ih_t, bias, w_hh_t)

    return h_out[None], c_out[None]   # (num_layers=1, B, H) each


def encoder_ref(x, params):
    """Pure-JAX f32 reference identical to the PyTorch Encoder semantics."""
    emb_w, w_ih, w_hh, b_ih, b_hh = params
    H = emb_w.shape[1]
    B = x.shape[0]
    embedded = emb_w[x]                                  # (B, T, H)
    h = jnp.zeros((B, H), jnp.float32)
    c = jnp.zeros((B, H), jnp.float32)

    def step(carry, x_t):
        h, c = carry
        gates = x_t @ w_ih.T + b_ih + h @ w_hh.T + b_hh
        i = jax.nn.sigmoid(gates[:, 0 * H:1 * H])
        f = jax.nn.sigmoid(gates[:, 1 * H:2 * H])
        g = jnp.tanh(gates[:, 2 * H:3 * H])
        o = jax.nn.sigmoid(gates[:, 3 * H:4 * H])
        c = f * c + i * g
        h = o * jnp.tanh(c)
        return (h, c), None

    (h, c), _ = lax.scan(step, (h, c), jnp.transpose(embedded, (1, 0, 2)))
    return h[None], c[None]


def init_params(key, input_size, hidden_size):
    """Deterministic param init (shapes from Encoder.__init__)."""
    ks = jax.random.split(key, 5)
    k = 1.0 / jnp.sqrt(hidden_size)
    u = lambda kk, shape: jax.random.uniform(kk, shape, jnp.float32, -k, k)
    emb_w = jax.random.normal(ks[0], (input_size, hidden_size), jnp.float32)
    w_ih = u(ks[1], (4 * hidden_size, hidden_size))
    w_hh = u(ks[2], (4 * hidden_size, hidden_size))
    b_ih = u(ks[3], (4 * hidden_size,))
    b_hh = u(ks[4], (4 * hidden_size,))
    return (emb_w, w_ih, w_hh, b_ih, b_hh)


if __name__ == "__main__":
    # Small shapes consistent with the module (hidden scaled 256 -> 128 so each
    # gate slice is a full 128-lane span; vocab = len(input_vocab) = 11).
    B, T, H = 2, 8, 128
    INPUT_SIZE = 11
    NUM_LAYERS = 1

    root = jax.random.PRNGKey(0)
    k_param, k_x = jax.random.split(root, 2)

    params = init_params(k_param, INPUT_SIZE, H)
    x = jax.random.randint(k_x, (B, T), 0, INPUT_SIZE, dtype=jnp.int32)

    h_out, c_out = encoder_forward(x, params)
    jax.block_until_ready((h_out, c_out))

    h_ref, c_ref = encoder_ref(x, params)
    assert h_out.shape == (NUM_LAYERS, B, H)
    assert c_out.shape == (NUM_LAYERS, B, H)
    # Tolerance loosened (2e-5 -> 2e-2) because the recurrent matmul now uses
    # bf16 weights with f32 accumulation, per the performance review.
    assert jnp.allclose(h_out, h_ref, atol=2e-2, rtol=2e-2), \
        float(jnp.max(jnp.abs(h_out - h_ref)))
    assert jnp.allclose(c_out, c_ref, atol=2e-2, rtol=2e-2), \
        float(jnp.max(jnp.abs(c_out - c_ref)))

    print("KERNEL_OK")
</pallas_src>

<mosaic_0001>
module attributes {stable_mosaic.version = 11 : i64} {
  func.func @encoder_kernel(%arg0: memref<2x8xi32, #tpu.memory_space<smem>>, %arg1: memref<16x128xf32, #tpu.memory_space<vmem>>, %arg2: memref<128x512xf32, #tpu.memory_space<vmem>>, %arg3: memref<1x512xf32, #tpu.memory_space<vmem>>, %arg4: memref<128x512xbf16, #tpu.memory_space<vmem>>, %arg5: memref<2x128xf32, #tpu.memory_space<vmem>>, %arg6: memref<2x128xf32, #tpu.memory_space<vmem>>, %arg7: memref<16x512xf32, #tpu.memory_space<vmem>>, %arg8: memref<8x2x512xf32, #tpu.memory_space<vmem>>) attributes {dimension_semantics = [], scalar_prefetch = 0 : i64, scratch_operands = 2 : i64, tpu.core_type = #tpu.core_type<tc>} {
    %c0 = arith.constant 0 : index
    %c0_0 = arith.constant 0 : index
    %0 = vector.load %arg1[%c0, %c0_0] : memref<16x128xf32, #tpu.memory_space<vmem>>, vector<16x128xf32>
    %c0_1 = arith.constant 0 : index
    %c0_2 = arith.constant 0 : index
    %1 = vector.load %arg2[%c0_1, %c0_2] : memref<128x512xf32, #tpu.memory_space<vmem>>, vector<128x512xf32>
    %cst = arith.constant dense<0.000000e+00> : vector<16x512xf32>
    %2 = tpu.matmul %0, %1, %cst {dimension_numbers = #tpu.dot_dimension_numbers<[1], [0], [0], [1], [0, 0, 1, 1], [], []>} : vector<16x128xf32>, vector<128x512xf32>, vector<16x512xf32> -> vector<16x512xf32>
    %c0_3 = arith.constant 0 : index
    %c0_4 = arith.constant 0 : index
    %3 = vector.load %arg3[%c0_3, %c0_4] : memref<1x512xf32, #tpu.memory_space<vmem>>, vector<1x512xf32>
    %4 = vector.broadcast %3 : vector<1x512xf32> to vector<16x512xf32>
    %5 = arith.addf %2, %4 : vector<16x512xf32>
    %c0_5 = arith.constant 0 : index
    %c0_6 = arith.constant 0 : index
    %6 = vector.load %arg7[%c0_5, %c0_6] : memref<16x512xf32, #tpu.memory_space<vmem>>, vector<16x512xf32>
    tpu.vector_store %arg7[%c0_5, %c0_6], %5 {strides = array<i32>} : memref<16x512xf32, #tpu.memory_space<vmem>>, vector<16x512xf32>,
    %c0_7 = arith.constant 0 : index
    %c0_8 = arith.constant 0 : index
    %7 = memref.load %arg0[%c0_7, %c0_8] : memref<2x8xi32, #tpu.memory_space<smem>>
    %8 = arith.index_cast %7 : i32 to index
    %c0_9 = arith.constant 0 : index
    %9 = vector.load %arg7[%8, %c0_9] : memref<16x512xf32, #tpu.memory_space<vmem>>, vector<1x512xf32>
    %c0_10 = arith.constant 0 : index
    %c0_11 = arith.constant 0 : index
    %c0_12 = arith.constant 0 : index
    %10 = vector.load %arg8[%c0_10, %c0_11, %c0_12] : memref<8x2x512xf32, #tpu.memory_space<vmem>>, vector<1x1x512xf32>
    %11 = vector.shape_cast %10 : vector<1x1x512xf32> to vector<1x512xf32>
    %12 = vector.shape_cast %9 : vector<1x512xf32> to vector<1x1x512xf32>
    tpu.vector_store %arg8[%c0_10, %c0_11, %c0_12], %12 {strides = array<i32>} : memref<8x2x512xf32, #tpu.memory_space<vmem>>, vector<1x1x512xf32>,
    %c1 = arith.constant 1 : index
    %c0_13 = arith.constant 0 : index
    %13 = memref.load %arg0[%c1, %c0_13] : memref<2x8xi32, #tpu.memory_space<smem>>
    %14 = arith.index_cast %13 : i32 to index
    %c0_14 = arith.constant 0 : index
    %15 = vector.load %arg7[%14, %c0_14] : memref<16x512xf32, #tpu.memory_space<vmem>>, vector<1x512xf32>
    %c0_15 = arith.constant 0 : index
    %c1_16 = arith.constant 1 : index
    %c0_17 = arith.constant 0 : index
    %16 = vector.load %arg8[%c0_15, %c1_16, %c0_17] : memref<8x2x512xf32, #tpu.memory_space<vmem>>, vector<1x1x512xf32>
    %17 = vector.shape_cast %16 : vector<1x1x512xf32> to vector<1x512xf32>
    %18 = vector.shape_cast %15 : vector<1x512xf32> to vector<1x1x512xf32>
    tpu.vector_store %arg8[%c0_15, %c1_16, %c0_17], %18 {strides = array<i32>} : memref<8x2x512xf32, #tpu.memory_space<vmem>>, vector<1x1x512xf32>,
    %c0_18 = arith.constant 0 : index
    %c1_19 = arith.constant 1 : index
    %19 = memref.load %arg0[%c0_18, %c1_19] : memref<2x8xi32, #tpu.memory_space<smem>>
    %20 = arith.index_cast %19 : i32 to index
    %c0_20 = arith.constant 0 : index
    %21 = vector.load %arg7[%20, %c0_20] : memref<16x512xf32, #tpu.memory_space<vmem>>, vector<1x512xf32>
    %c1_21 = arith.constant 1 : index
    %c0_22 = arith.constant 0 : index
    %c0_23 = arith.constant 0 : index
    %22 = vector.load %arg8[%c1_21, %c0_22, %c0_23] : memref<8x2x512xf32, #tpu.memory_space<vmem>>, vector<1x1x512xf32>
    %23 = vector.shape_cast %22 : vector<1x1x512xf32> to vector<1x512xf32>
    %24 = vector.shape_cast %21 : vector<1x512xf32> to vector<1x1x512xf32>
    tpu.vector_store %arg8[%c1_21, %c0_22, %c0_23], %24 {strides = array<i32>} : memref<8x2x512xf32, #tpu.memory_space<vmem>>, vector<1x1x512xf32>,
    %c1_24 = arith.constant 1 : index
    %c1_25 = arith.constant 1 : index
    %25 = memref.load %arg0[%c1_24, %c1_25] : memref<2x8xi32, #tpu.memory_space<smem>>
    %26 = arith.index_cast %25 : i32 to index
    %c0_26 = arith.constant 0 : index
    %27 = vector.load %arg7[%26, %c0_26] : memref<16x512xf32, #tpu.memory_space<vmem>>, vector<1x512xf32>
    %c1_27 = arith.constant 1 : index
    %c1_28 = arith.constant 1 : index
    %c0_29 = arith.constant 0 : index
    %28 = vector.load %arg8[%c1_27, %c1_28, %c0_29] : memref<8x2x512xf32, #tpu.memory_space<vmem>>, vector<1x1x512xf32>
    %29 = vector.shape_cast %28 : vector<1x1x512xf32> to vector<1x512xf32>
    %30 = vector.shape_cast %27 : vector<1x512xf32> to vector<1x1x512xf32>
    tpu.vector_store %arg8[%c1_27, %c1_28, %c0_29], %30 {strides = array<i32>} : memref<8x2x512xf32, #tpu.memory_space<vmem>>, vector<1x1x512xf32>,
    %c0_30 = arith.constant 0 : index
    %c2 = arith.constant 2 : index
    %31 = memref.load %arg0[%c0_30, %c2] : memref<2x8xi32, #tpu.memory_space<smem>>
    %32 = arith.index_cast %31 : i32 to index
    %c0_31 = arith.constant 0 : index
    %33 = vector.load %arg7[%32, %c0_31] : memref<16x512xf32, #tpu.memory_space<vmem>>, vector<1x512xf32>
    %c2_32 = arith.constant 2 : index
    %c0_33 = arith.constant 0 : index
    %c0_34 = arith.constant 0 : index
    %34 = vector.load %arg8[%c2_32, %c0_33, %c0_34] : memref<8x2x512xf32, #tpu.memory_space<vmem>>, vector<1x1x512xf32>
    %35 = vector.shape_cast %34 : vector<1x1x512xf32> to vector<1x512xf32>
    %36 = vector.shape_cast %33 : vector<1x512xf32> to vector<1x1x512xf32>
    tpu.vector_store %arg8[%c2_32, %c0_33, %c0_34], %36 {strides = array<i32>} : memref<8x2x512xf32, #tpu.memory_space<vmem>>, vector<1x1x512xf32>,
    %c1_35 = arith.constant 1 : index
    %c2_36 = arith.constant 2 : index
    %37 = memref.load %arg0[%c1_35, %c2_36] : memref<2x8xi32, #tpu.memory_space<smem>>
    %38 = arith.index_cast %37 : i32 to index
    %c0_37 = arith.constant 0 : index
    %39 = vector.load %arg7[%38, %c0_37] : memref<16x512xf32, #tpu.memory_space<vmem>>, vector<1x512xf32>
    %c2_38 = arith.constant 2 : index
    %c1_39 = arith.constant 1 : index
    %c0_40 = arith.constant 0 : index
    %40 = vector.load %arg8[%c2_38, %c1_39, %c0_40] : memref<8x2x512xf32, #tpu.memory_space<vmem>>, vector<1x1x512xf32>
    %41 = vector.shape_cast %40 : vector<1x1x512xf32> to vector<1x512xf32>
    %42 = vector.shape_cast %39 : vector<1x512xf32> to vector<1x1x512xf32>
    tpu.vector_store %arg8[%c2_38, %c1_39, %c0_40], %42 {strides = array<i32>} : memref<8x2x512xf32, #tpu.memory_space<vmem>>, vector<1x1x512xf32>,
    %c0_41 = arith.constant 0 : index
    %c3 = arith.constant 3 : index
    %43 = memref.load %arg0[%c0_41, %c3] : memref<2x8xi32, #tpu.memory_space<smem>>
    %44 = arith.index_cast %43 : i32 to index
    %c0_42 = arith.constant 0 : index
    %45 = vector.load %arg7[%44, %c0_42] : memref<16x512xf32, #tpu.memory_space<vmem>>, vector<1x512xf32>
    %c3_43 = arith.constant 3 : index
    %c0_44 = arith.constant 0 : index
    %c0_45 = arith.constant 0 : index
    %46 = vector.load %arg8[%c3_43, %c0_44, %c0_45] : memref<8x2x512xf32, #tpu.memory_space<vmem>>, vector<1x1x512xf32>
    %47 = vector.shape_cast %46 : vector<1x1x512xf32> to vector<1x512xf32>
    %48 = vector.shape_cast %45 : vector<1x512xf32> to vector<1x1x512xf32>
    tpu.vector_store %arg8[%c3_43, %c0_44, %c0_45], %48 {strides = array<i32>} : memref<8x2x512xf32, #tpu.memory_space<vmem>>, vector<1x1x512xf32>,
    %c1_46 = arith.constant 1 : index
    %c3_47 = arith.constant 3 : index
    %49 = memref.load %arg0[%c1_46, %c3_47] : memref<2x8xi32, #tpu.memory_space<smem>>
    %50 = arith.index_cast %49 : i32 to index
    %c0_48 = arith.constant 0 : index
    %51 = vector.load %arg7[%50, %c0_48] : memref<16x512xf32, #tpu.memory_space<vmem>>, vector<1x512xf32>
    %c3_49 = arith.constant 3 : index
    %c1_50 = arith.constant 1 : index
    %c0_51 = arith.constant 0 : index
    %52 = vector.load %arg8[%c3_49, %c1_50, %c0_51] : memref<8x2x512xf32, #tpu.memory_space<vmem>>, vector<1x1x512xf32>
    %53 = vector.shape_cast %52 : vector<1x1x512xf32> to vector<1x512xf32>
    %54 = vector.shape_cast %51 : vector<1x512xf32> to vector<1x1x512xf32>
    tpu.vector_store %arg8[%c3_49, %c1_50, %c0_51], %54 {strides = array<i32>} : memref<8x2x512xf32, #tpu.memory_space<vmem>>, vector<1x1x512xf32>,
    %c0_52 = arith.constant 0 : index
    %c4 = arith.constant 4 : index
    %55 = memref.load %arg0[%c0_52, %c4] : memref<2x8xi32, #tpu.memory_space<smem>>
    %56 = arith.index_cast %55 : i32 to index
    %c0_53 = arith.constant 0 : index
    %57 = vector.load %arg7[%56, %c0_53] : memref<16x512xf32, #tpu.memory_space<vmem>>, vector<1x512xf32>
    %c4_54 = arith.constant 4 : index
    %c0_55 = arith.constant 0 : index
    %c0_56 = arith.constant 0 : index
    %58 = vector.load %arg8[%c4_54, %c0_55, %c0_56] : memref<8x2x512xf32, #tpu.memory_space<vmem>>, vector<1x1x512xf32>
    %59 = vector.shape_cast %58 : vector<1x1x512xf32> to vector<1x512xf32>
    %60 = vector.shape_cast %57 : vector<1x512xf32> to vector<1x1x512xf32>
    tpu.vector_store %arg8[%c4_54, %c0_55, %c0_56], %60 {strides = array<i32>} : memref<8x2x512xf32, #tpu.memory_space<vmem>>, vector<1x1x512xf32>,
    %c1_57 = arith.constant 1 : index
    %c4_58 = arith.constant 4 : index
    %61 = memref.load %arg0[%c1_57, %c4_58] : memref<2x8xi32, #tpu.memory_space<smem>>
    %62 = arith.index_cast %61 : i32 to index
    %c0_59 = arith.constant 0 : index
    %63 = vector.load %arg7[%62, %c0_59] : memref<16x512xf32, #tpu.memory_space<vmem>>, vector<1x512xf32>
    %c4_60 = arith.constant 4 : index
    %c1_61 = arith.constant 1 : index
    %c0_62 = arith.constant 0 : index
    %64 = vector.load %arg8[%c4_60, %c1_61, %c0_62] : memref<8x2x512xf32, #tpu.memory_space<vmem>>, vector<1x1x512xf32>
    %65 = vector.shape_cast %64 : vector<1x1x512xf32> to vector<1x512xf32>
    %66 = vector.shape_cast %63 : vector<1x512xf32> to vector<1x1x512xf32>
    tpu.vector_store %arg8[%c4_60, %c1_61, %c0_62], %66 {strides = array<i32>} : memref<8x2x512xf32, #tpu.memory_space<vmem>>, vector<1x1x512xf32>,
    %c0_63 = arith.constant 0 : index
    %c5 = arith.constant 5 : index
    %67 = memref.load %arg0[%c0_63, %c5] : memref<2x8xi32, #tpu.memory_space<smem>>
    %68 = arith.index_cast %67 : i32 to index
    %c0_64 = arith.constant 0 : index
    %69 = vector.load %arg7[%68, %c0_64] : memref<16x512xf32, #tpu.memory_space<vmem>>, vector<1x512xf32>
    %c5_65 = arith.constant 5 : index
    %c0_66 = arith.constant 0 : index
    %c0_67 = arith.constant 0 : index
    %70 = vector.load %arg8[%c5_65, %c0_66, %c0_67] : memref<8x2x512xf32, #tpu.memory_space<vmem>>, vector<1x1x512xf32>
    %71 = vector.shape_cast %70 : vector<1x1x512xf32> to vector<1x512xf32>
    %72 = vector.shape_cast %69 : vector<1x512xf32> to vector<1x1x512xf32>
    tpu.vector_store %arg8[%c5_65, %c0_66, %c0_67], %72 {strides = array<i32>} : memref<8x2x512xf32, #tpu.memory_space<vmem>>, vector<1x1x512xf32>,
    %c1_68 = arith.constant 1 : index
    %c5_69 = arith.constant 5 : index
    %73 = memref.load %arg0[%c1_68, %c5_69] : memref<2x8xi32, #tpu.memory_space<smem>>
    %74 = arith.index_cast %73 : i32 to index
    %c0_70 = arith.constant 0 : index
    %75 = vector.load %arg7[%74, %c0_70] : memref<16x512xf32, #tpu.memory_space<vmem>>, vector<1x512xf32>
    %c5_71 = arith.constant 5 : index
    %c1_72 = arith.constant 1 : index
    %c0_73 = arith.constant 0 : index
    %76 = vector.load %arg8[%c5_71, %c1_72, %c0_73] : memref<8x2x512xf32, #tpu.memory_space<vmem>>, vector<1x1x512xf32>
    %77 = vector.shape_cast %76 : vector<1x1x512xf32> to vector<1x512xf32>
    %78 = vector.shape_cast %75 : vector<1x512xf32> to vector<1x1x512xf32>
    tpu.vector_store %arg8[%c5_71, %c1_72, %c0_73], %78 {strides = array<i32>} : memref<8x2x512xf32, #tpu.memory_space<vmem>>, vector<1x1x512xf32>,
    %c0_74 = arith.constant 0 : index
    %c6 = arith.constant 6 : index
    %79 = memref.load %arg0[%c0_74, %c6] : memref<2x8xi32, #tpu.memory_space<smem>>
    %80 = arith.index_cast %79 : i32 to index
    %c0_75 = arith.constant 0 : index
    %81 = vector.load %arg7[%80, %c0_75] : memref<16x512xf32, #tpu.memory_space<vmem>>, vector<1x512xf32>
    %c6_76 = arith.constant 6 : index
    %c0_77 = arith.constant 0 : index
    %c0_78 = arith.constant 0 : index
    %82 = vector.load %arg8[%c6_76, %c0_77, %c0_78] : memref<8x2x512xf32, #tpu.memory_space<vmem>>, vector<1x1x512xf32>
    %83 = vector.shape_cast %82 : vector<1x1x512xf32> to vector<1x512xf32>
    %84 = vector.shape_cast %81 : vector<1x512xf32> to vector<1x1x512xf32>
    tpu.vector_store %arg8[%c6_76, %c0_77, %c0_78], %84 {strides = array<i32>} : memref<8x2x512xf32, #tpu.memory_space<vmem>>, vector<1x1x512xf32>,
    %c1_79 = arith.constant 1 : index
    %c6_80 = arith.constant 6 : index
    %85 = memref.load %arg0[%c1_79, %c6_80] : memref<2x8xi32, #tpu.memory_space<smem>>
    %86 = arith.index_cast %85 : i32 to index
    %c0_81 = arith.constant 0 : index
    %87 = vector.load %arg7[%86, %c0_81] : memref<16x512xf32, #tpu.memory_space<vmem>>, vector<1x512xf32>
    %c6_82 = arith.constant 6 : index
    %c1_83 = arith.constant 1 : index
    %c0_84 = arith.constant 0 : index
    %88 = vector.load %arg8[%c6_82, %c1_83, %c0_84] : memref<8x2x512xf32, #tpu.memory_space<vmem>>, vector<1x1x512xf32>
    %89 = vector.shape_cast %88 : vector<1x1x512xf32> to vector<1x512xf32>
    %90 = vector.shape_cast %87 : vector<1x512xf32> to vector<1x1x512xf32>
    tpu.vector_store %arg8[%c6_82, %c1_83, %c0_84], %90 {strides = array<i32>} : memref<8x2x512xf32, #tpu.memory_space<vmem>>, vector<1x1x512xf32>,
    %c0_85 = arith.constant 0 : index
    %c7 = arith.constant 7 : index
    %91 = memref.load %arg0[%c0_85, %c7] : memref<2x8xi32, #tpu.memory_space<smem>>
    %92 = arith.index_cast %91 : i32 to index
    %c0_86 = arith.constant 0 : index
    %93 = vector.load %arg7[%92, %c0_86] : memref<16x512xf32, #tpu.memory_space<vmem>>, vector<1x512xf32>
    %c7_87 = arith.constant 7 : index
    %c0_88 = arith.constant 0 : index
    %c0_89 = arith.constant 0 : index
    %94 = vector.load %arg8[%c7_87, %c0_88, %c0_89] : memref<8x2x512xf32, #tpu.memory_space<vmem>>, vector<1x1x512xf32>
    %95 = vector.shape_cast %94 : vector<1x1x512xf32> to vector<1x512xf32>
    %96 = vector.shape_cast %93 : vector<1x512xf32> to vector<1x1x512xf32>
    tpu.vector_store %arg8[%c7_87, %c0_88, %c0_89], %96 {strides = array<i32>} : memref<8x2x512xf32, #tpu.memory_space<vmem>>, vector<1x1x512xf32>,
    %c1_90 = arith.constant 1 : index
    %c7_91 = arith.constant 7 : index
    %97 = memref.load %arg0[%c1_90, %c7_91] : memref<2x8xi32, #tpu.memory_space<smem>>
    %98 = arith.index_cast %97 : i32 to index
    %c0_92 = arith.constant 0 : index
    %99 = vector.load %arg7[%98, %c0_92] : memref<16x512xf32, #tpu.memory_space<vmem>>, vector<1x512xf32>
    %c7_93 = arith.constant 7 : index
    %c1_94 = arith.constant 1 : index
    %c0_95 = arith.constant 0 : index
    %100 = vector.load %arg8[%c7_93, %c1_94, %c0_95] : memref<8x2x512xf32, #tpu.memory_space<vmem>>, vector<1x1x512xf32>
    %101 = vector.shape_cast %100 : vector<1x1x512xf32> to vector<1x512xf32>
    %102 = vector.shape_cast %99 : vector<1x512xf32> to vector<1x1x512xf32>
    tpu.vector_store %arg8[%c7_93, %c1_94, %c0_95], %102 {strides = array<i32>} : memref<8x2x512xf32, #tpu.memory_space<vmem>>, vector<1x1x512xf32>,
    %c0_96 = arith.constant 0 : index
    %c0_97 = arith.constant 0 : index
    %103 = vector.load %arg4[%c0_96, %c0_97] : memref<128x512xbf16, #tpu.memory_space<vmem>>, vector<128x512xbf16>
    %cst_98 = arith.constant 0.000000e+00 : f32
    %104 = vector.broadcast %cst_98 : f32 to vector<2x128xf32>
    %cst_99 = arith.constant 0.000000e+00 : f32
    %105 = vector.broadcast %cst_99 : f32 to vector<2x128xf32>
    %c0_i32 = arith.constant 0 : i32
    %106 = arith.index_cast %c0_i32 : i32 to index
    %c0_100 = arith.constant 0 : index
    %c0_101 = arith.constant 0 : index
    %107 = vector.load %arg8[%106, %c0_100, %c0_101] : memref<8x2x512xf32, #tpu.memory_space<vmem>>, vector<1x2x512xf32>
    %108 = vector.shape_cast %107 : vector<1x2x512xf32> to vector<2x512xf32>
    %109 = arith.truncf %104 : vector<2x128xf32> to vector<2x128xbf16>
    %cst_102 = arith.constant dense<0.000000e+00> : vector<2x512xf32>
    %110 = tpu.matmul %109, %103, %cst_102 {dimension_numbers = #tpu.dot_dimension_numbers<[1], [0], [0], [1], [0, 0, 1, 1], [], []>} : vector<2x128xbf16>, vector<128x512xbf16>, vector<2x512xf32> -> vector<2x512xf32>
    %111 = arith.addf %108, %110 : vector<2x512xf32>
    %112 = vector.extract_strided_slice %111 {offsets = [0, 0], sizes = [2, 128], strides = [1, 1]} : vector<2x512xf32> to vector<2x128xf32>
    %cst_103 = arith.constant 5.000000e-01 : f32
    %113 = vector.broadcast %cst_103 : f32 to vector<2x128xf32>
    %114 = arith.mulf %113, %112 : vector<2x128xf32>
    %115 = math.tanh %114 : vector<2x128xf32>
    %cst_104 = arith.constant 5.000000e-01 : f32
    %116 = vector.broadcast %cst_104 : f32 to vector<2x128xf32>
    %117 = arith.mulf %116, %115 : vector<2x128xf32>
    %cst_105 = arith.constant 5.000000e-01 : f32
    %118 = vector.broadcast %cst_105 : f32 to vector<2x128xf32>
    %119 = arith.addf %117, %118 : vector<2x128xf32>
    %120 = vector.extract_strided_slice %111 {offsets = [0, 128], sizes = [2, 128], strides = [1, 1]} : vector<2x512xf32> to vector<2x128xf32>
    %cst_106 = arith.constant 5.000000e-01 : f32
    %121 = vector.broadcast %cst_106 : f32 to vector<2x128xf32>
    %122 = arith.mulf %121, %120 : vector<2x128xf32>
    %123 = math.tanh %122 : vector<2x128xf32>
    %cst_107 = arith.constant 5.000000e-01 : f32
    %124 = vector.broadcast %cst_107 : f32 to vector<2x128xf32>
    %125 = arith.mulf %124, %123 : vector<2x128xf32>
    %cst_108 = arith.constant 5.000000e-01 : f32
    %126 = vector.broadcast %cst_108 : f32 to vector<2x128xf32>
    %127 = arith.addf %125, %126 : vector<2x128xf32>
    %128 = vector.extract_strided_slice %111 {offsets = [0, 256], sizes = [2, 128], strides = [1, 1]} : vector<2x512xf32> to vector<2x128xf32>
    %129 = math.tanh %128 : vector<2x128xf32>
    %130 = vector.extract_strided_slice %111 {offsets = [0, 384], sizes = [2, 128], strides = [1, 1]} : vector<2x512xf32> to vector<2x128xf32>
    %cst_109 = arith.constant 5.000000e-01 : f32
    %131 = vector.broadcast %cst_109 : f32 to vector<2x128xf32>
    %132 = arith.mulf %131, %130 : vector<2x128xf32>
    %133 = math.tanh %132 : vector<2x128xf32>
    %cst_110 = arith.constant 5.000000e-01 : f32
    %134 = vector.broadcast %cst_110 : f32 to vector<2x128xf32>
    %135 = arith.mulf %134, %133 : vector<2x128xf32>
    %cst_111 = arith.constant 5.000000e-01 : f32
    %136 = vector.broadcast %cst_111 : f32 to vector<2x128xf32>
    %137 = arith.addf %135, %136 : vector<2x128xf32>
    %138 = arith.mulf %127, %105 : vector<2x128xf32>
    %139 = arith.mulf %119, %129 : vector<2x128xf32>
    %140 = arith.addf %138, %139 : vector<2x128xf32>
    %141 = math.tanh %140 : vector<2x128xf32>
    %142 = arith.mulf %137, %141 : vector<2x128xf32>
    %c1_i32 = arith.constant 1 : i32
    %143 = arith.index_cast %c1_i32 : i32 to index
    %c0_112 = arith.constant 0 : index
    %c0_113 = arith.constant 0 : index
    %144 = vector.load %arg8[%143, %c0_112, %c0_113] : memref<8x2x512xf32, #tpu.memory_space<vmem>>, vector<1x2x512xf32>
    %145 = vector.shape_cast %144 : vector<1x2x512xf32> to vector<2x512xf32>
    %146 = arith.truncf %142 : vector<2x128xf32> to vector<2x128xbf16>
    %cst_114 = arith.constant dense<0.000000e+00> : vector<2x512xf32>
    %147 = tpu.matmul %146, %103, %cst_114 {dimension_numbers = #tpu.dot_dimension_numbers<[1], [0], [0], [1], [0, 0, 1, 1], [], []>} : vector<2x128xbf16>, vector<128x512xbf16>, vector<2x512xf32> -> vector<2x512xf32>
    %148 = arith.addf %145, %147 : vector<2x512xf32>
    %149 = vector.extract_strided_slice %148 {offsets = [0, 0], sizes = [2, 128], strides = [1, 1]} : vector<2x512xf32> to vector<2x128xf32>
    %cst_115 = arith.constant 5.000000e-01 : f32
    %150 = vector.broadcast %cst_115 : f32 to vector<2x128xf32>
    %151 = arith.mulf %150, %149 : vector<2x128xf32>
    %152 = math.tanh %151 : vector<2x128xf32>
    %cst_116 = arith.constant 5.000000e-01 : f32
    %153 = vector.broadcast %cst_116 : f32 to vector<2x128xf32>
    %154 = arith.mulf %153, %152 : vector<2x128xf32>
    %cst_117 = arith.constant 5.000000e-01 : f32
    %155 = vector.broadcast %cst_117 : f32 to vector<2x128xf32>
    %156 = arith.addf %154, %155 : vector<2x128xf32>
    %157 = vector.extract_strided_slice %148 {offsets = [0, 128], sizes = [2, 128], strides = [1, 1]} : vector<2x512xf32> to vector<2x128xf32>
    %cst_118 = arith.constant 5.000000e-01 : f32
    %158 = vector.broadcast %cst_118 : f32 to vector<2x128xf32>
    %159 = arith.mulf %158, %157 : vector<2x128xf32>
    %160 = math.tanh %159 : vector<2x128xf32>
    %cst_119 = arith.constant 5.000000e-01 : f32
    %161 = vector.broadcast %cst_119 : f32 to vector<2x128xf32>
    %162 = arith.mulf %161, %160 : vector<2x128xf32>
    %cst_120 = arith.constant 5.000000e-01 : f32
    %163 = vector.broadcast %cst_120 : f32 to vector<2x128xf32>
    %164 = arith.addf %162, %163 : vector<2x128xf32>
    %165 = vector.extract_strided_slice %148 {offsets = [0, 256], sizes = [2, 128], strides = [1, 1]} : vector<2x512xf32> to vector<2x128xf32>
    %166 = math.tanh %165 : vector<2x128xf32>
    %167 = vector.extract_strided_slice %148 {offsets = [0, 384], sizes = [2, 128], strides = [1, 1]} : vector<2x512xf32> to vector<2x128xf32>
    %cst_121 = arith.constant 5.000000e-01 : f32
    %168 = vector.broadcast %cst_121 : f32 to vector<2x128xf32>
    %169 = arith.mulf %168, %167 : vector<2x128xf32>
    %170 = math.tanh %169 : vector<2x128xf32>
    %cst_122 = arith.constant 5.000000e-01 : f32
    %171 = vector.broadcast %cst_122 : f32 to vector<2x128xf32>
    %172 = arith.mulf %171, %170 : vector<2x128xf32>
    %cst_123 = arith.constant 5.000000e-01 : f32
    %173 = vector.broadcast %cst_123 : f32 to vector<2x128xf32>
    %174 = arith.addf %172, %173 : vector<2x128xf32>
    %175 = arith.mulf %164, %140 : vector<2x128xf32>
    %176 = arith.mulf %156, %166 : vector<2x128xf32>
    %177 = arith.addf %175, %176 : vector<2x128xf32>
    %178 = math.tanh %177 : vector<2x128xf32>
    %179 = arith.mulf %174, %178 : vector<2x128xf32>
    %c2_i32 = arith.constant 2 : i32
    %180 = arith.index_cast %c2_i32 : i32 to index
    %c0_124 = arith.constant 0 : index
    %c0_125 = arith.constant 0 : index
    %181 = vector.load %arg8[%180, %c0_124, %c0_125] : memref<8x2x512xf32, #tpu.memory_space<vmem>>, vector<1x2x512xf32>
    %182 = vector.shape_cast %181 : vector<1x2x512xf32> to vector<2x512xf32>
    %183 = arith.truncf %179 : vector<2x128xf32> to vector<2x128xbf16>
    %cst_126 = arith.constant dense<0.000000e+00> : vector<2x512xf32>
    %184 = tpu.matmul %183, %103, %cst_126 {dimension_numbers = #tpu.dot_dimension_numbers<[1], [0], [0], [1], [0, 0, 1, 1], [], []>} : vector<2x128xbf16>, vector<128x512xbf16>, vector<2x512xf32> -> vector<2x512xf32>
    %185 = arith.addf %182, %184 : vector<2x512xf32>
    %186 = vector.extract_strided_slice %185 {offsets = [0, 0], sizes = [2, 128], strides = [1, 1]} : vector<2x512xf32> to vector<2x128xf32>
    %cst_127 = arith.constant 5.000000e-01 : f32
    %187 = vector.broadcast %cst_127 : f32 to vector<2x128xf32>
    %188 = arith.mulf %187, %186 : vector<2x128xf32>
    %189 = math.tanh %188 : vector<2x128xf32>
    %cst_128 = arith.constant 5.000000e-01 : f32
    %190 = vector.broadcast %cst_128 : f32 to vector<2x128xf32>
    %191 = arith.mulf %190, %189 : vector<2x128xf32>
    %cst_129 = arith.constant 5.000000e-01 : f32
    %192 = vector.broadcast %cst_129 : f32 to vector<2x128xf32>
    %193 = arith.addf %191, %192 : vector<2x128xf32>
    %194 = vector.extract_strided_slice %185 {offsets = [0, 128], sizes = [2, 128], strides = [1, 1]} : vector<2x512xf32> to vector<2x128xf32>
    %cst_130 = arith.constant 5.000000e-01 : f32
    %195 = vector.broadcast %cst_130 : f32 to vector<2x128xf32>
    %196 = arith.mulf %195, %194 : vector<2x128xf32>
    %197 = math.tanh %196 : vector<2x128xf32>
    %cst_131 = arith.constant 5.000000e-01 : f32
    %198 = vector.broadcast %cst_131 : f32 to vector<2x128xf32>
    %199 = arith.mulf %198, %197 : vector<2x128xf32>
    %cst_132 = arith.constant 5.000000e-01 : f32
    %200 = vector.broadcast %cst_132 : f32 to vector<2x128xf32>
    %201 = arith.addf %199, %200 : vector<2x128xf32>
    %202 = vector.extract_strided_slice %185 {offsets = [0, 256], sizes = [2, 128], strides = [1, 1]} : vector<2x512xf32> to vector<2x128xf32>
    %203 = math.tanh %202 : vector<2x128xf32>
    %204 = vector.extract_strided_slice %185 {offsets = [0, 384], sizes = [2, 128], strides = [1, 1]} : vector<2x512xf32> to vector<2x128xf32>
    %cst_133 = arith.constant 5.000000e-01 : f32
    %205 = vector.broadcast %cst_133 : f32 to vector<2x128xf32>
    %206 = arith.mulf %205, %204 : vector<2x128xf32>
    %207 = math.tanh %206 : vector<2x128xf32>
    %cst_134 = arith.constant 5.000000e-01 : f32
    %208 = vector.broadcast %cst_134 : f32 to vector<2x128xf32>
    %209 = arith.mulf %208, %207 : vector<2x128xf32>
    %cst_135 = arith.constant 5.000000e-01 : f32
    %210 = vector.broadcast %cst_135 : f32 to vector<2x128xf32>
    %211 = arith.addf %209, %210 : vector<2x128xf32>
    %212 = arith.mulf %201, %177 : vector<2x128xf32>
    %213 = arith.mulf %193, %203 : vector<2x128xf32>
    %214 = arith.addf %212, %213 : vector<2x128xf32>
    %215 = math.tanh %214 : vector<2x128xf32>
    %216 = arith.mulf %211, %215 : vector<2x128xf32>
    %c3_i32 = arith.constant 3 : i32
    %217 = arith.index_cast %c3_i32 : i32 to index
    %c0_136 = arith.constant 0 : index
    %c0_137 = arith.constant 0 : index
    %218 = vector.load %arg8[%217, %c0_136, %c0_137] : memref<8x2x512xf32, #tpu.memory_space<vmem>>, vector<1x2x512xf32>
    %219 = vector.shape_cast %218 : vector<1x2x512xf32> to vector<2x512xf32>
    %220 = arith.truncf %216 : vector<2x128xf32> to vector<2x128xbf16>
    %cst_138 = arith.constant dense<0.000000e+00> : vector<2x512xf32>
    %221 = tpu.matmul %220, %103, %cst_138 {dimension_numbers = #tpu.dot_dimension_numbers<[1], [0], [0], [1], [0, 0, 1, 1], [], []>} : vector<2x128xbf16>, vector<128x512xbf16>, vector<2x512xf32> -> vector<2x512xf32>
    %222 = arith.addf %219, %221 : vector<2x512xf32>
    %223 = vector.extract_strided_slice %222 {offsets = [0, 0], sizes = [2, 128], strides = [1, 1]} : vector<2x512xf32> to vector<2x128xf32>
    %cst_139 = arith.constant 5.000000e-01 : f32
    %224 = vector.broadcast %cst_139 : f32 to vector<2x128xf32>
    %225 = arith.mulf %224, %223 : vector<2x128xf32>
    %226 = math.tanh %225 : vector<2x128xf32>
    %cst_140 = arith.constant 5.000000e-01 : f32
    %227 = vector.broadcast %cst_140 : f32 to vector<2x128xf32>
    %228 = arith.mulf %227, %226 : vector<2x128xf32>
    %cst_141 = arith.constant 5.000000e-01 : f32
    %229 = vector.broadcast %cst_141 : f32 to vector<2x128xf32>
    %230 = arith.addf %228, %229 : vector<2x128xf32>
    %231 = vector.extract_strided_slice %222 {offsets = [0, 128], sizes = [2, 128], strides = [1, 1]} : vector<2x512xf32> to vector<2x128xf32>
    %cst_142 = arith.constant 5.000000e-01 : f32
    %232 = vector.broadcast %cst_142 : f32 to vector<2x128xf32>
    %233 = arith.mulf %232, %231 : vector<2x128xf32>
    %234 = math.tanh %233 : vector<2x128xf32>
    %cst_143 = arith.constant 5.000000e-01 : f32
    %235 = vector.broadcast %cst_143 : f32 to vector<2x128xf32>
    %236 = arith.mulf %235, %234 : vector<2x128xf32>
    %cst_144 = arith.constant 5.000000e-01 : f32
    %237 = vector.broadcast %cst_144 : f32 to vector<2x128xf32>
    %238 = arith.addf %236, %237 : vector<2x128xf32>
    %239 = vector.extract_strided_slice %222 {offsets = [0, 256], sizes = [2, 128], strides = [1, 1]} : vector<2x512xf32> to vector<2x128xf32>
    %240 = math.tanh %239 : vector<2x128xf32>
    %241 = vector.extract_strided_slice %222 {offsets = [0, 384], sizes = [2, 128], strides = [1, 1]} : vector<2x512xf32> to vector<2x128xf32>
    %cst_145 = arith.constant 5.000000e-01 : f32
    %242 = vector.broadcast %cst_145 : f32 to vector<2x128xf32>
    %243 = arith.mulf %242, %241 : vector<2x128xf32>
    %244 = math.tanh %243 : vector<2x128xf32>
    %cst_146 = arith.constant 5.000000e-01 : f32
    %245 = vector.broadcast %cst_146 : f32 to vector<2x128xf32>
    %246 = arith.mulf %245, %244 : vector<2x128xf32>
    %cst_147 = arith.constant 5.000000e-01 : f32
    %247 = vector.broadcast %cst_147 : f32 to vector<2x128xf32>
    %248 = arith.addf %246, %247 : vector<2x128xf32>
    %249 = arith.mulf %238, %214 : vector<2x128xf32>
    %250 = arith.mulf %230, %240 : vector<2x128xf32>
    %251 = arith.addf %249, %250 : vector<2x128xf32>
    %252 = math.tanh %251 : vector<2x128xf32>
    %253 = arith.mulf %248, %252 : vector<2x128xf32>
    %c4_i32 = arith.constant 4 : i32
    %254 = arith.index_cast %c4_i32 : i32 to index
    %c0_148 = arith.constant 0 : index
    %c0_149 = arith.constant 0 : index
    %255 = vector.load %arg8[%254, %c0_148, %c0_149] : memref<8x2x512xf32, #tpu.memory_space<vmem>>, vector<1x2x512xf32>
    %256 = vector.shape_cast %255 : vector<1x2x512xf32> to vector<2x512xf32>
    %257 = arith.truncf %253 : vector<2x128xf32> to vector<2x128xbf16>
    %cst_150 = arith.constant dense<0.000000e+00> : vector<2x512xf32>
    %258 = tpu.matmul %257, %103, %cst_150 {dimension_numbers = #tpu.dot_dimension_numbers<[1], [0], [0], [1], [0, 0, 1, 1], [], []>} : vector<2x128xbf16>, vector<128x512xbf16>, vector<2x512xf32> -> vector<2x512xf32>
    %259 = arith.addf %256, %258 : vector<2x512xf32>
    %260 = vector.extract_strided_slice %259 {offsets = [0, 0], sizes = [2, 128], strides = [1, 1]} : vector<2x512xf32> to vector<2x128xf32>
    %cst_151 = arith.constant 5.000000e-01 : f32
    %261 = vector.broadcast %cst_151 : f32 to vector<2x128xf32>
    %262 = arith.mulf %261, %260 : vector<2x128xf32>
    %263 = math.tanh %262 : vector<2x128xf32>
    %cst_152 = arith.constant 5.000000e-01 : f32
    %264 = vector.broadcast %cst_152 : f32 to vector<2x128xf32>
    %265 = arith.mulf %264, %263 : vector<2x128xf32>
    %cst_153 = arith.constant 5.000000e-01 : f32
    %266 = vector.broadcast %cst_153 : f32 to vector<2x128xf32>
    %267 = arith.addf %265, %266 : vector<2x128xf32>
    %268 = vector.extract_strided_slice %259 {offsets = [0, 128], sizes = [2, 128], strides = [1, 1]} : vector<2x512xf32> to vector<2x128xf32>
    %cst_154 = arith.constant 5.000000e-01 : f32
    %269 = vector.broadcast %cst_154 : f32 to vector<2x128xf32>
    %270 = arith.mulf %269, %268 : vector<2x128xf32>
    %271 = math.tanh %270 : vector<2x128xf32>
    %cst_155 = arith.constant 5.000000e-01 : f32
    %272 = vector.broadcast %cst_155 : f32 to vector<2x128xf32>
    %273 = arith.mulf %272, %271 : vector<2x128xf32>
    %cst_156 = arith.constant 5.000000e-01 : f32
    %274 = vector.broadcast %cst_156 : f32 to vector<2x128xf32>
    %275 = arith.addf %273, %274 : vector<2x128xf32>
    %276 = vector.extract_strided_slice %259 {offsets = [0, 256], sizes = [2, 128], strides = [1, 1]} : vector<2x512xf32> to vector<2x128xf32>
    %277 = math.tanh %276 : vector<2x128xf32>
    %278 = vector.extract_strided_slice %259 {offsets = [0, 384], sizes = [2, 128], strides = [1, 1]} : vector<2x512xf32> to vector<2x128xf32>
    %cst_157 = arith.constant 5.000000e-01 : f32
    %279 = vector.broadcast %cst_157 : f32 to vector<2x128xf32>
    %280 = arith.mulf %279, %278 : vector<2x128xf32>
    %281 = math.tanh %280 : vector<2x128xf32>
    %cst_158 = arith.constant 5.000000e-01 : f32
    %282 = vector.broadcast %cst_158 : f32 to vector<2x128xf32>
    %283 = arith.mulf %282, %281 : vector<2x128xf32>
    %cst_159 = arith.constant 5.000000e-01 : f32
    %284 = vector.broadcast %cst_159 : f32 to vector<2x128xf32>
    %285 = arith.addf %283, %284 : vector<2x128xf32>
    %286 = arith.mulf %275, %251 : vector<2x128xf32>
    %287 = arith.mulf %267, %277 : vector<2x128xf32>
    %288 = arith.addf %286, %287 : vector<2x128xf32>
    %289 = math.tanh %288 : vector<2x128xf32>
    %290 = arith.mulf %285, %289 : vector<2x128xf32>
    %c5_i32 = arith.constant 5 : i32
    %291 = arith.index_cast %c5_i32 : i32 to index
    %c0_160 = arith.constant 0 : index
    %c0_161 = arith.constant 0 : index
    %292 = vector.load %arg8[%291, %c0_160, %c0_161] : memref<8x2x512xf32, #tpu.memory_space<vmem>>, vector<1x2x512xf32>
    %293 = vector.shape_cast %292 : vector<1x2x512xf32> to vector<2x512xf32>
    %294 = arith.truncf %290 : vector<2x128xf32> to vector<2x128xbf16>
    %cst_162 = arith.constant dense<0.000000e+00> : vector<2x512xf32>
    %295 = tpu.matmul %294, %103, %cst_162 {dimension_numbers = #tpu.dot_dimension_numbers<[1], [0], [0], [1], [0, 0, 1, 1], [], []>} : vector<2x128xbf16>, vector<128x512xbf16>, vector<2x512xf32> -> vector<2x512xf32>
    %296 = arith.addf %293, %295 : vector<2x512xf32>
    %297 = vector.extract_strided_slice %296 {offsets = [0, 0], sizes = [2, 128], strides = [1, 1]} : vector<2x512xf32> to vector<2x128xf32>
    %cst_163 = arith.constant 5.000000e-01 : f32
    %298 = vector.broadcast %cst_163 : f32 to vector<2x128xf32>
    %299 = arith.mulf %298, %297 : vector<2x128xf32>
    %300 = math.tanh %299 : vector<2x128xf32>
    %cst_164 = arith.constant 5.000000e-01 : f32
    %301 = vector.broadcast %cst_164 : f32 to vector<2x128xf32>
    %302 = arith.mulf %301, %300 : vector<2x128xf32>
    %cst_165 = arith.constant 5.000000e-01 : f32
    %303 = vector.broadcast %cst_165 : f32 to vector<2x128xf32>
    %304 = arith.addf %302, %303 : vector<2x128xf32>
    %305 = vector.extract_strided_slice %296 {offsets = [0, 128], sizes = [2, 128], strides = [1, 1]} : vector<2x512xf32> to vector<2x128xf32>
    %cst_166 = arith.constant 5.000000e-01 : f32
    %306 = vector.broadcast %cst_166 : f32 to vector<2x128xf32>
    %307 = arith.mulf %306, %305 : vector<2x128xf32>
    %308 = math.tanh %307 : vector<2x128xf32>
    %cst_167 = arith.constant 5.000000e-01 : f32
    %309 = vector.broadcast %cst_167 : f32 to vector<2x128xf32>
    %310 = arith.mulf %309, %308 : vector<2x128xf32>
    %cst_168 = arith.constant 5.000000e-01 : f32
    %311 = vector.broadcast %cst_168 : f32 to vector<2x128xf32>
    %312 = arith.addf %310, %311 : vector<2x128xf32>
    %313 = vector.extract_strided_slice %296 {offsets = [0, 256], sizes = [2, 128], strides = [1, 1]} : vector<2x512xf32> to vector<2x128xf32>
    %314 = math.tanh %313 : vector<2x128xf32>
    %315 = vector.extract_strided_slice %296 {offsets = [0, 384], sizes = [2, 128], strides = [1, 1]} : vector<2x512xf32> to vector<2x128xf32>
    %cst_169 = arith.constant 5.000000e-01 : f32
    %316 = vector.broadcast %cst_169 : f32 to vector<2x128xf32>
    %317 = arith.mulf %316, %315 : vector<2x128xf32>
    %318 = math.tanh %317 : vector<2x128xf32>
    %cst_170 = arith.constant 5.000000e-01 : f32
    %319 = vector.broadcast %cst_170 : f32 to vector<2x128xf32>
    %320 = arith.mulf %319, %318 : vector<2x128xf32>
    %cst_171 = arith.constant 5.000000e-01 : f32
    %321 = vector.broadcast %cst_171 : f32 to vector<2x128xf32>
    %322 = arith.addf %320, %321 : vector<2x128xf32>
    %323 = arith.mulf %312, %288 : vector<2x128xf32>
    %324 = arith.mulf %304, %314 : vector<2x128xf32>
    %325 = arith.addf %323, %324 : vector<2x128xf32>
    %326 = math.tanh %325 : vector<2x128xf32>
    %327 = arith.mulf %322, %326 : vector<2x128xf32>
    %c6_i32 = arith.constant 6 : i32
    %328 = arith.index_cast %c6_i32 : i32 to index
    %c0_172 = arith.constant 0 : index
    %c0_173 = arith.constant 0 : index
    %329 = vector.load %arg8[%328, %c0_172, %c0_173] : memref<8x2x512xf32, #tpu.memory_space<vmem>>, vector<1x2x512xf32>
    %330 = vector.shape_cast %329 : vector<1x2x512xf32> to vector<2x512xf32>
    %331 = arith.truncf %327 : vector<2x128xf32> to vector<2x128xbf16>
    %cst_174 = arith.constant dense<0.000000e+00> : vector<2x512xf32>
    %332 = tpu.matmul %331, %103, %cst_174 {dimension_numbers = #tpu.dot_dimension_numbers<[1], [0], [0], [1], [0, 0, 1, 1], [], []>} : vector<2x128xbf16>, vector<128x512xbf16>, vector<2x512xf32> -> vector<2x512xf32>
    %333 = arith.addf %330, %332 : vector<2x512xf32>
    %334 = vector.extract_strided_slice %333 {offsets = [0, 0], sizes = [2, 128], strides = [1, 1]} : vector<2x512xf32> to vector<2x128xf32>
    %cst_175 = arith.constant 5.000000e-01 : f32
    %335 = vector.broadcast %cst_175 : f32 to vector<2x128xf32>
    %336 = arith.mulf %335, %334 : vector<2x128xf32>
    %337 = math.tanh %336 : vector<2x128xf32>
    %cst_176 = arith.constant 5.000000e-01 : f32
    %338 = vector.broadcast %cst_176 : f32 to vector<2x128xf32>
    %339 = arith.mulf %338, %337 : vector<2x128xf32>
    %cst_177 = arith.constant 5.000000e-01 : f32
    %340 = vector.broadcast %cst_177 : f32 to vector<2x128xf32>
    %341 = arith.addf %339, %340 : vector<2x128xf32>
    %342 = vector.extract_strided_slice %333 {offsets = [0, 128], sizes = [2, 128], strides = [1, 1]} : vector<2x512xf32> to vector<2x128xf32>
    %cst_178 = arith.constant 5.000000e-01 : f32
    %343 = vector.broadcast %cst_178 : f32 to vector<2x128xf32>
    %344 = arith.mulf %343, %342 : vector<2x128xf32>
    %345 = math.tanh %344 : vector<2x128xf32>
    %cst_179 = arith.constant 5.000000e-01 : f32
    %346 = vector.broadcast %cst_179 : f32 to vector<2x128xf32>
    %347 = arith.mulf %346, %345 : vector<2x128xf32>
    %cst_180 = arith.constant 5.000000e-01 : f32
    %348 = vector.broadcast %cst_180 : f32 to vector<2x128xf32>
    %349 = arith.addf %347, %348 : vector<2x128xf32>
    %350 = vector.extract_strided_slice %333 {offsets = [0, 256], sizes = [2, 128], strides = [1, 1]} : vector<2x512xf32> to vector<2x128xf32>
    %351 = math.tanh %350 : vector<2x128xf32>
    %352 = vector.extract_strided_slice %333 {offsets = [0, 384], sizes = [2, 128], strides = [1, 1]} : vector<2x512xf32> to vector<2x128xf32>
    %cst_181 = arith.constant 5.000000e-01 : f32
    %353 = vector.broadcast %cst_181 : f32 to vector<2x128xf32>
    %354 = arith.mulf %353, %352 : vector<2x128xf32>
    %355 = math.tanh %354 : vector<2x128xf32>
    %cst_182 = arith.constant 5.000000e-01 : f32
    %356 = vector.broadcast %cst_182 : f32 to vector<2x128xf32>
    %357 = arith.mulf %356, %355 : vector<2x128xf32>
    %cst_183 = arith.constant 5.000000e-01 : f32
    %358 = vector.broadcast %cst_183 : f32 to vector<2x128xf32>
    %359 = arith.addf %357, %358 : vector<2x128xf32>
    %360 = arith.mulf %349, %325 : vector<2x128xf32>
    %361 = arith.mulf %341, %351 : vector<2x128xf32>
    %362 = arith.addf %360, %361 : vector<2x128xf32>
    %363 = math.tanh %362 : vector<2x128xf32>
    %364 = arith.mulf %359, %363 : vector<2x128xf32>
    %c7_i32 = arith.constant 7 : i32
    %365 = arith.index_cast %c7_i32 : i32 to index
    %c0_184 = arith.constant 0 : index
    %c0_185 = arith.constant 0 : index
    %366 = vector.load %arg8[%365, %c0_184, %c0_185] : memref<8x2x512xf32, #tpu.memory_space<vmem>>, vector<1x2x512xf32>
    %367 = vector.shape_cast %366 : vector<1x2x512xf32> to vector<2x512xf32>
    %368 = arith.truncf %364 : vector<2x128xf32> to vector<2x128xbf16>
    %cst_186 = arith.constant dense<0.000000e+00> : vector<2x512xf32>
    %369 = tpu.matmul %368, %103, %cst_186 {dimension_numbers = #tpu.dot_dimension_numbers<[1], [0], [0], [1], [0, 0, 1, 1], [], []>} : vector<2x128xbf16>, vector<128x512xbf16>, vector<2x512xf32> -> vector<2x512xf32>
    %370 = arith.addf %367, %369 : vector<2x512xf32>
    %371 = vector.extract_strided_slice %370 {offsets = [0, 0], sizes = [2, 128], strides = [1, 1]} : vector<2x512xf32> to vector<2x128xf32>
    %cst_187 = arith.constant 5.000000e-01 : f32
    %372 = vector.broadcast %cst_187 : f32 to vector<2x128xf32>
    %373 = arith.mulf %372, %371 : vector<2x128xf32>
    %374 = math.tanh %373 : vector<2x128xf32>
    %cst_188 = arith.constant 5.000000e-01 : f32
    %375 = vector.broadcast %cst_188 : f32 to vector<2x128xf32>
    %376 = arith.mulf %375, %374 : vector<2x128xf32>
    %cst_189 = arith.constant 5.000000e-01 : f32
    %377 = vector.broadcast %cst_189 : f32 to vector<2x128xf32>
    %378 = arith.addf %376, %377 : vector<2x128xf32>
    %379 = vector.extract_strided_slice %370 {offsets = [0, 128], sizes = [2, 128], strides = [1, 1]} : vector<2x512xf32> to vector<2x128xf32>
    %cst_190 = arith.constant 5.000000e-01 : f32
    %380 = vector.broadcast %cst_190 : f32 to vector<2x128xf32>
    %381 = arith.mulf %380, %379 : vector<2x128xf32>
    %382 = math.tanh %381 : vector<2x128xf32>
    %cst_191 = arith.constant 5.000000e-01 : f32
    %383 = vector.broadcast %cst_191 : f32 to vector<2x128xf32>
    %384 = arith.mulf %383, %382 : vector<2x128xf32>
    %cst_192 = arith.constant 5.000000e-01 : f32
    %385 = vector.broadcast %cst_192 : f32 to vector<2x128xf32>
    %386 = arith.addf %384, %385 : vector<2x128xf32>
    %387 = vector.extract_strided_slice %370 {offsets = [0, 256], sizes = [2, 128], strides = [1, 1]} : vector<2x512xf32> to vector<2x128xf32>
    %388 = math.tanh %387 : vector<2x128xf32>
    %389 = vector.extract_strided_slice %370 {offsets = [0, 384], sizes = [2, 128], strides = [1, 1]} : vector<2x512xf32> to vector<2x128xf32>
    %cst_193 = arith.constant 5.000000e-01 : f32
    %390 = vector.broadcast %cst_193 : f32 to vector<2x128xf32>
    %391 = arith.mulf %390, %389 : vector<2x128xf32>
    %392 = math.tanh %391 : vector<2x128xf32>
    %cst_194 = arith.constant 5.000000e-01 : f32
    %393 = vector.broadcast %cst_194 : f32 to vector<2x128xf32>
    %394 = arith.mulf %393, %392 : vector<2x128xf32>
    %cst_195 = arith.constant 5.000000e-01 : f32
    %395 = vector.broadcast %cst_195 : f32 to vector<2x128xf32>
    %396 = arith.addf %394, %395 : vector<2x128xf32>
    %397 = arith.mulf %386, %362 : vector<2x128xf32>
    %398 = arith.mulf %378, %388 : vector<2x128xf32>
    %399 = arith.addf %397, %398 : vector<2x128xf32>
    %400 = math.tanh %399 : vector<2x128xf32>
    %401 = arith.mulf %396, %400 : vector<2x128xf32>
    %c8_i32 = arith.constant 8 : i32
    %c0_196 = arith.constant 0 : index
    %c0_197 = arith.constant 0 : index
    %402 = vector.load %arg5[%c0_196, %c0_197] : memref<2x128xf32, #tpu.memory_space<vmem>>, vector<2x128xf32>
    tpu.vector_store %arg5[%c0_196, %c0_197], %401 {strides = array<i32>} : memref<2x128xf32, #tpu.memory_space<vmem>>, vector<2x128xf32>,
    %c0_198 = arith.constant 0 : index
    %c0_199 = arith.constant 0 : index
    %403 = vector.load %arg6[%c0_198, %c0_199] : memref<2x128xf32, #tpu.memory_space<vmem>>, vector<2x128xf32>
    tpu.vector_store %arg6[%c0_198, %c0_199], %399 {strides = array<i32>} : memref<2x128xf32, #tpu.memory_space<vmem>>, vector<2x128xf32>,
    return
  }
}

</mosaic_0001>

<bundles_post_ra>
// kernel: tpu_custom_call.1
= control target key start
LH: loop header
LB: loop body
LE: loop exit
PB: predicated region body
PF: predicated region fallthrough
CT: control target
= control target key end

     0   :  { %s2524_s0 = inlined_call_operand.hbm [shape: s32[2,8], index: 0, kind: input, shape index: {}]   ;;  %s2525_s1 = inlined_call_operand.hbm [shape: f32[16,128], index: 1, kind: input, shape index: {}]   ;;  %s2526_s2 = inlined_call_operand.hbm [shape: f32[128,512], index: 2, kind: input, shape index: {}]   ;;  %s2527_s3 = inlined_call_operand.hbm [shape: f32[1,512], index: 3, kind: input, shape index: {}]   ;;  %s2528_s4 = inlined_call_operand.hbm [shape: bf16[128,512], index: 4, kind: input, shape index: {}]   ;;  %s2529_s5 = inlined_call_operand.hbm [shape: f32[2,128], index: 5, kind: output, shape index: {0}]   ;;  %s2530_s6 = inlined_call_operand.hbm [shape: f32[2,128], index: 6, kind: output, shape index: {1}]  }
   0x1   :  { %2531 = sst [smem:[#allocation24_spill]] %s2529_s5 }
   0x2   :  { %2532 = sst [smem:[#allocation25_spill]] %s2530_s6 }
   0x3   :  { %12 = vsyncpa [#allocation7], 0 }
   0x4   :  { %13 = vsyncpa [#allocation5], 0 }
   0x5   :  { %14 = vsyncpa [#allocation10], 0 }
   0x6   :  { %15 = vsyncpa [#allocation13], 0 }
   0x7   :  { %16 = vsyncpa [#allocation6], 0  ;;  %s44_s23 = sshll.u32 %s2526_s2, 4  ;;  %s45_s23 = int_to_ptr.hbm [resolvable:$true] %s44_s23 }
   0x8   :  { %17 = vsyncpa [#allocation16], 0  ;;  %s1970_s24 = smov [#allocation9]   ;;  %s23_s28 = sshll.u32 %s2524_s0, 4  ;;  %s24_s28 = int_to_ptr.hbm [resolvable:$true] %s23_s28 }
   0x9   :  { %s46_s25 = sshll.u32 %s1970_s24, 4  ;;  %s1971_s29 = smov 512   ;;  %s47_s25 = int_to_ptr.vmem [resolvable:$true] %s46_s25 }
   0xa   :  { %s1972_s30 = smov 32   ;;  %s1973_s7 = smov [#allocation4]  }
   0xb   :  { %52 = dma.hbm_to_vmem [thread:$0]  %s45_s23, 8192, %s47_s25, [#allocation10], %s1971_s29, %s1971_s29, %s1972_s30  }
   0xc   :  { %26 = dma.hbm_to_smem %s24_s28, 32, %s1973_s7, [#allocation7]  }
   0xd   :  { %s31_s10 = sshll.u32 %s2525_s1, 4  ;;  %s1974_s2 = smov [#allocation8]   ;;  %s32_s10 = int_to_ptr.hbm [resolvable:$true] %s31_s10 }
   0xe   :  { %s33_s11 = sshll.u32 %s1974_s2, 4  ;;  %s58_s14 = sshll.u32 %s2527_s3, 4  ;;  %s34_s11 = int_to_ptr.vmem [resolvable:$true] %s33_s11  ;;  %s59_s14 = int_to_ptr.hbm [resolvable:$true] %s58_s14 }
   0xf   :  { %s1975_s15 = smov 128   ;;  %s1976_s0 = smov 8  }
  0x10   :  { %39 = dma.hbm_to_vmem [thread:$0]  %s32_s10, 256, %s34_s11, [#allocation5], %s1975_s15, %s1975_s15, %s1976_s0  }
  0x11   :  { %s1977_s16 = smov [#allocation11]   ;;  %s68_s20 = sshll.u32 %s2528_s4, 4  ;;  %s69_s20 = int_to_ptr.hbm [resolvable:$true] %s68_s20 }
  0x12   :  { %s60_s17 = sshll.u32 %s1977_s16, 4  ;;  %s1978_s1 = smov [#allocation12]   ;;  %s61_s17 = int_to_ptr.vmem [resolvable:$true] %s60_s17 }
  0x13   :  { %63 = dma.hbm_to_vmem [thread:$0]  %s59_s14, 64, %s61_s17, [#allocation10]  }
  0x14   :  { %s70_s21 = sshll.u32 %s1978_s1, 4  ;;  %s1979_s22 = smov 256   ;;  %s71_s21 = int_to_ptr.vmem [resolvable:$true] %s70_s21 }
  0x15   :  { %s1980_s23 = smov 16  }
  0x16   :  { %76 = dma.hbm_to_vmem [thread:$0]  %s69_s20, 4096, %s71_s21, [#allocation13], %s1979_s22, %s1979_s22, %s1980_s23  }
  0x17   :  { %1958 = dma.done.wait [#allocation7], 32  }
  0x18   :  { %1959 = vsyncadd [#allocation7], 4294967264 }
  0x19   :  { %1960 = dma.done.wait [#allocation5], 256  }
  0x1a   :  { %1961 = vsyncadd [#allocation5], 4294967040 }
  0x1b   :  { %1962 = dma.done.wait [#allocation10], 8256  }
  0x1c   :  { %1963 = vsyncadd [#allocation10], 4294959040 }
  0x1d   :  { %1964 = dma.done.wait [#allocation13], 4096  }
  0x1e   :  { %1965 = vsyncadd [#allocation13], 4294963200 }
  0x1f   :  { %97 = sfence }
  0x20   :  { %v161_v0 = vld [vmem:[#allocation9 + $0x1e0] sm:$0xff]  ;;  %v162_v1 = vld [vmem:[#allocation9 + $0x1e8] sm:$0xff]  ;;  %v163_v2 = vld [vmem:[#allocation9 + $0x1f0] sm:$0xff]  ;;  %s275_s3 = sld [smem:[#allocation4]]  ;;  %vm722_vm1 = vcmask 1041408   ;;  %vm724_vm2 = vcmask 1045508  }
  0x21   :  { %175 = vmatpush.msra.mxu0 %v161_v0  ;;  %198 = vmatpush.msra.mxu1 %v162_v1  ;;  %v164_v3 = vld [vmem:[#allocation9 + $0x1f8] sm:$0xff]  ;;  %v157_v4 = vld [vmem:[#allocation9 + $0x1c0] sm:$0xff]  ;;  %v158_v5 = vld [vmem:[#allocation9 + $0x1c8] sm:$0xff]  ;;  %s1487_s4 = sld [smem:[#allocation4 + $0x80]]  ;;  %vm726_vm3 = vcmask 1043456  }
  0x22   :  { %221 = vmatpush.msra.mxu2 %v163_v2  ;;  %244 = vmatpush.msra.mxu3 %v164_v3  ;;  %v159_v6 = vld [vmem:[#allocation9 + $0x1d0] sm:$0xff]  ;;  %v160_v7 = vld [vmem:[#allocation9 + $0x1d8] sm:$0xff]  ;;  %v153_v8 = vld [vmem:[#allocation9 + $0x1a0] sm:$0xff]  ;;  %s1490_s24 = sld [smem:[#allocation4 + $0x1]] }
  0x23   :  { %176 = vmatpush.msra.mxu0 %v157_v4  ;;  %199 = vmatpush.msra.mxu1 %v158_v5  ;;  %v154_v9 = vld [vmem:[#allocation9 + $0x1a8] sm:$0xff]  ;;  %v155_v10 = vld [vmem:[#allocation9 + $0x1b0] sm:$0xff]  ;;  %v156_v11 = vld [vmem:[#allocation9 + $0x1b8] sm:$0xff]  ;;  %s1493_s25 = sld [smem:[#allocation4 + $0x81]] }
  0x24   :  { %222 = vmatpush.msra.mxu2 %v159_v6  ;;  %245 = vmatpush.msra.mxu3 %v160_v7  ;;  %v149_v12 = vld [vmem:[#allocation9 + $0x180] sm:$0xff]  ;;  %v150_v13 = vld [vmem:[#allocation9 + $0x188] sm:$0xff]  ;;  %v151_v14 = vld [vmem:[#allocation9 + $0x190] sm:$0xff]  ;;  %s1496_s27 = sld [smem:[#allocation4 + $0x2]] }
  0x25   :  { %177 = vmatpush.msra.mxu0 %v153_v8  ;;  %200 = vmatpush.msra.mxu1 %v154_v9  ;;  %v152_v15 = vld [vmem:[#allocation9 + $0x198] sm:$0xff]  ;;  %v145_v16 = vld [vmem:[#allocation9 + $0x160] sm:$0xff]  ;;  %v146_v17 = vld [vmem:[#allocation9 + $0x168] sm:$0xff]  ;;  %s1499_s7 = sld [smem:[#allocation4 + $0x82]] }
  0x26   :  { %223 = vmatpush.msra.mxu2 %v155_v10  ;;  %246 = vmatpush.msra.mxu3 %v156_v11  ;;  %v147_v18 = vld [vmem:[#allocation9 + $0x170] sm:$0xff]  ;;  %v148_v19 = vld [vmem:[#allocation9 + $0x178] sm:$0xff]  ;;  %v141_v20 = vld [vmem:[#allocation9 + $0x140] sm:$0xff]  ;;  %s276_s26 = sshra.s32 %s275_s3, 3  ;;  %s279_s28 = sand.u32 7, %s275_s3 }
  0x27   :  { %178 = vmatpush.msra.mxu0 %v149_v12  ;;  %201 = vmatpush.msra.mxu1 %v150_v13  ;;  %v142_v21 = vld [vmem:[#allocation9 + $0x148] sm:$0xff]  ;;  %v143_v22 = vld [vmem:[#allocation9 + $0x150] sm:$0xff]  ;;  %v144_v23 = vld [vmem:[#allocation9 + $0x158] sm:$0xff]  ;;  %s1660_s29 = sshll.u32 %s276_s26, 5  ;;  %s291_s30 = sshra.s32 %s1487_s4, 3 }
  0x28   :  { %224 = vmatpush.msra.mxu2 %v151_v14  ;;  %247 = vmatpush.msra.mxu3 %v152_v15  ;;  %v137_v24 = vld [vmem:[#allocation9 + $0x120] sm:$0xff]  ;;  %v138_v25 = vld [vmem:[#allocation9 + $0x128] sm:$0xff]  ;;  %v139_v26 = vld [vmem:[#allocation9 + $0x130] sm:$0xff]  ;;  %s2194_s8 = sadd.s32 %s1660_s29, %s279_s28  ;;  %s303_s9 = sshra.s32 %s1490_s24, 3 }
  0x29   :  { %179 = vmatpush.msra.mxu0 %v145_v16  ;;  %202 = vmatpush.msra.mxu1 %v146_v17  ;;  %v140_v27 = vld [vmem:[#allocation9 + $0x138] sm:$0xff]  ;;  %v133_v28 = vld [vmem:[#allocation9 + $0x100] sm:$0xff]  ;;  %v134_v29 = vld [vmem:[#allocation9 + $0x108] sm:$0xff]  ;;  %s294_s10 = sand.u32 7, %s1487_s4  ;;  %s315_s2 = sshra.s32 %s1493_s25, 3 }
  0x2a   :  { %225 = vmatpush.msra.mxu2 %v147_v18  ;;  %248 = vmatpush.msra.mxu3 %v148_v19  ;;  %v135_v30 = vld [vmem:[#allocation9 + $0x110] sm:$0xff]  ;;  %v136_v31 = vld [vmem:[#allocation9 + $0x118] sm:$0xff]  ;;  %v129_v32 = vld [vmem:[#allocation9 + $0xe0] sm:$0xff]  ;;  %s1661_s11 = sshll.u32 %s291_s30, 5  ;;  %s306_s12 = sand.u32 7, %s1490_s24 }
  0x2b   :  { %180 = vmatpush.msra.mxu0 %v141_v20  ;;  %203 = vmatpush.msra.mxu1 %v142_v21  ;;  %v130_v33 = vld [vmem:[#allocation9 + $0xe8] sm:$0xff]  ;;  %v131_v34 = vld [vmem:[#allocation9 + $0xf0] sm:$0xff]  ;;  %v132_v35 = vld [vmem:[#allocation9 + $0xf8] sm:$0xff]  ;;  %s1662_s13 = sshll.u32 %s303_s9, 5  ;;  %s318_s14 = sand.u32 7, %s1493_s25 }
  0x2c   :  { %226 = vmatpush.msra.mxu2 %v143_v22  ;;  %249 = vmatpush.msra.mxu3 %v144_v23  ;;  %v125_v36 = vld [vmem:[#allocation9 + $0xc0] sm:$0xff]  ;;  %v126_v37 = vld [vmem:[#allocation9 + $0xc8] sm:$0xff]  ;;  %v127_v38 = vld [vmem:[#allocation9 + $0xd0] sm:$0xff]  ;;  %s1663_s15 = sshll.u32 %s315_s2, 5  ;;  %s1502_s0 = sld [smem:[#allocation4 + $0x3]] }
  0x2d   :  { %181 = vmatpush.msra.mxu0 %v137_v24  ;;  %204 = vmatpush.msra.mxu1 %v138_v25  ;;  %v128_v39 = vld [vmem:[#allocation9 + $0xd8] sm:$0xff]  ;;  %v121_v40 = vld [vmem:[#allocation9 + $0xa0] sm:$0xff]  ;;  %v122_v41 = vld [vmem:[#allocation9 + $0xa8] sm:$0xff]  ;;  %s327_s16 = sshra.s32 %s1496_s27, 3  ;;  %s2196_s17 = sadd.s32 %s1661_s11, %s294_s10 }
  0x2e   :  { %227 = vmatpush.msra.mxu2 %v139_v26  ;;  %250 = vmatpush.msra.mxu3 %v140_v27  ;;  %v123_v42 = vld [vmem:[#allocation9 + $0xb0] sm:$0xff]  ;;  %v124_v43 = vld [vmem:[#allocation9 + $0xb8] sm:$0xff]  ;;  %v117_v44 = vld [vmem:[#allocation9 + $0x80] sm:$0xff]  ;;  %s2198_s18 = sadd.s32 %s1662_s13, %s306_s12  ;;  %s2200_s19 = sadd.s32 %s1663_s15, %s318_s14 }
  0x2f   :  { %182 = vmatpush.msra.mxu0 %v133_v28  ;;  %205 = vmatpush.msra.mxu1 %v134_v29  ;;  %v118_v45 = vld [vmem:[#allocation9 + $0x88] sm:$0xff]  ;;  %v119_v46 = vld [vmem:[#allocation9 + $0x90] sm:$0xff]  ;;  %v120_v47 = vld [vmem:[#allocation9 + $0x98] sm:$0xff]  ;;  %s339_s20 = sshra.s32 %s1499_s7, 3  ;;  %s330_s1 = sand.u32 7, %s1496_s27 }
  0x30   :  { %228 = vmatpush.msra.mxu2 %v135_v30  ;;  %251 = vmatpush.msra.mxu3 %v136_v31  ;;  %v113_v48 = vld [vmem:[#allocation9 + $0x60] sm:$0xff]  ;;  %v114_v49 = vld [vmem:[#allocation9 + $0x68] sm:$0xff]  ;;  %v115_v50 = vld [vmem:[#allocation9 + $0x70] sm:$0xff]  ;;  %s1664_s21 = sshll.u32 %s327_s16, 5  ;;  %s342_s22 = sand.u32 7, %s1499_s7 }
  0x31   :  { %183 = vmatpush.msra.mxu0 %v129_v32  ;;  %206 = vmatpush.msra.mxu1 %v130_v33  ;;  %v116_v51 = vld [vmem:[#allocation9 + $0x78] sm:$0xff]  ;;  %v109_v52 = vld [vmem:[#allocation9 + $0x40] sm:$0xff]  ;;  %v110_v53 = vld [vmem:[#allocation9 + $0x48] sm:$0xff]  ;;  %s2202_s23 = sld [smem:[#allocation4 + $0x83]]  ;;  %s1665_s3 = sshll.u32 %s339_s20, 5 }
  0x32   :  { %229 = vmatpush.msra.mxu2 %v131_v34  ;;  %252 = vmatpush.msra.mxu3 %v132_v35  ;;  %v111_v54 = vld [vmem:[#allocation9 + $0x50] sm:$0xff]  ;;  %v112_v55 = vld [vmem:[#allocation9 + $0x58] sm:$0xff]  ;;  %v105_v56 = vld [vmem:[#allocation9 + $0x20] sm:$0xff]  ;;  %s2204_s4 = sld [smem:[#allocation4 + $0x4]]  ;;  %s2206_s24 = sadd.s32 %s1664_s21, %s330_s1 }
  0x33   :  { %184 = vmatpush.msra.mxu0 %v125_v36  ;;  %207 = vmatpush.msra.mxu1 %v126_v37  ;;  %v106_v57 = vld [vmem:[#allocation9 + $0x28] sm:$0xff]  ;;  %v107_v58 = vld [vmem:[#allocation9 + $0x30] sm:$0xff]  ;;  %v108_v59 = vld [vmem:[#allocation9 + $0x38] sm:$0xff]  ;;  %s2208_s25 = sld [smem:[#allocation4 + $0x84]]  ;;  %s351_s26 = sshra.s32 %s1502_s0, 3 }
  0x34   :  { %230 = vmatpush.msra.mxu2 %v127_v38  ;;  %253 = vmatpush.msra.mxu3 %v128_v39  ;;  %v1646_v60 = vld [vmem:[#allocation12 + $0xe0] sm:$0xf]  ;;  %v1706_v61 = vld [vmem:[#allocation12 + $0xec] sm:$0xf0]  ;;  %v1704_v62 = vld [vmem:[#allocation12 + $0xe4] sm:$0xf]  ;;  %s2210_s28 = sadd.s32 %s1665_s3, %s342_s22 }
  0x35   :  { %185 = vmatpush.msra.mxu0 %v121_v40  ;;  %208 = vmatpush.msra.mxu1 %v122_v41  ;;  %v1648_v63 = vld [vmem:[#allocation12 + $0xf0] sm:$0xf0]  ;;  %v1654_v0 = vld [vmem:[#allocation12 + $0xe8] sm:$0xf]  ;;  %v1707_v1 = vld [vmem:[#allocation12 + $0xf4] sm:$0xf0]  ;;  %v2034_v8 = vor.u32 %v1706_v61, %v1646_v60 }
  0x36   :  { %231 = vmatpush.msra.mxu2 %v123_v42  ;;  %254 = vmatpush.msra.mxu3 %v124_v43  ;;  %v1705_v2 = vld [vmem:[#allocation12 + $0xec] sm:$0xf]  ;;  %v1656_v3 = vld [vmem:[#allocation12 + $0xf8] sm:$0xf0]  ;;  %v102_v5 = vld [vmem:[#allocation9 + $0x8] sm:$0xff]  ;;  %v2036_v9 = vor.u32 %v1704_v62, %v1648_v63  ;;  %v2038_v12 = vor.u32 %v1707_v1, %v1654_v0  ;;  %s354_s27 = sand.u32 7, %s1502_s0 }
  0x37   :  { %186 = vmatpush.msra.mxu0 %v117_v44  ;;  %209 = vmatpush.msra.mxu1 %v118_v45  ;;  %v101_v4 = vld [vmem:[#allocation9] sm:$0xff]  ;;  %v103_v6 = vld [vmem:[#allocation9 + $0x10] sm:$0xff]  ;;  %v104_v7 = vld [vmem:[#allocation9 + $0x18] sm:$0xff]  ;;  %v2040_v13 = vor.u32 %v1705_v2, %v1656_v3  ;;  %s1666_s29 = sshll.u32 %s351_s26, 5  ;;  %s2212_s30 = sld [smem:[#allocation4 + $0x5]] }
  0x38   :  { %232 = vmatpush.msra.mxu2 %v119_v46  ;;  %255 = vmatpush.msra.mxu3 %v120_v47  ;;  %v1630_v10 = vld [vmem:[#allocation12 + $0xc0] sm:$0xf]  ;;  %v1702_v11 = vld [vmem:[#allocation12 + $0xcc] sm:$0xf0]  ;;  %v1700_v14 = vld [vmem:[#allocation12 + $0xc4] sm:$0xf]  ;;  %s2217_s10 = sadd.s32 %s1666_s29, %s354_s27 }
  0x39   :  { %187 = vmatpush.msra.mxu0 %v113_v48  ;;  %210 = vmatpush.msra.mxu1 %v114_v49  ;;  %v1632_v15 = vld [vmem:[#allocation12 + $0xd0] sm:$0xf0]  ;;  %v1638_v16 = vld [vmem:[#allocation12 + $0xc8] sm:$0xf]  ;;  %v1703_v17 = vld [vmem:[#allocation12 + $0xd4] sm:$0xf0]  ;;  %v2044_v21 = vor.u32 %v1702_v11, %v1630_v10 }
  0x3a   :  { %233 = vmatpush.msra.mxu2 %v115_v50  ;;  %256 = vmatpush.msra.mxu3 %v116_v51  ;;  %v1701_v18 = vld [vmem:[#allocation12 + $0xcc] sm:$0xf]  ;;  %v1640_v19 = vld [vmem:[#allocation12 + $0xd8] sm:$0xf0]  ;;  %v2046_v22 = vor.u32 %v1700_v14, %v1632_v15  ;;  %v1614_v23 = vld [vmem:[#allocation12 + $0xa0] sm:$0xf]  ;;  %v2050_v25 = vor.u32 %v1703_v17, %v1638_v16 }
  0x3b   :  { %188 = vmatpush.msra.mxu0 %v109_v52  ;;  %211 = vmatpush.msra.mxu1 %v110_v53  ;;  %v99_v20 = vld [vmem:[#allocation8] sm:$0xff]  ;;  %v2052_v26 = vor.u32 %v1701_v18, %v1640_v19  ;;  %v1696_v27 = vld [vmem:[#allocation12 + $0xa4] sm:$0xf]  ;;  %v1616_v28 = vld [vmem:[#allocation12 + $0xb0] sm:$0xf0]  ;;  %s363_s7 = sshra.s32 %s2202_s23, 3 }
  0x3c   :  { %234 = vmatpush.msra.mxu2 %v111_v54  ;;  %257 = vmatpush.msra.mxu3 %v112_v55  ;;  %v1698_v24 = vld [vmem:[#allocation12 + $0xac] sm:$0xf0]  ;;  %v1622_v29 = vld [vmem:[#allocation12 + $0xa8] sm:$0xf]  ;;  %v1699_v30 = vld [vmem:[#allocation12 + $0xb4] sm:$0xf0]  ;;  %v2058_v34 = vor.u32 %v1696_v27, %v1616_v28 }
  0x3d   :  { %189 = vmatpush.msra.mxu0 %v105_v56  ;;  %212 = vmatpush.msra.mxu1 %v106_v57  ;;  %v1697_v31 = vld [vmem:[#allocation12 + $0xac] sm:$0xf]  ;;  %v1624_v32 = vld [vmem:[#allocation12 + $0xb8] sm:$0xf0]  ;;  %v2056_v33 = vor.u32 %v1698_v24, %v1614_v23  ;;  %v1598_v35 = vld [vmem:[#allocation12 + $0x80] sm:$0xf]  ;;  %v2062_v37 = vor.u32 %v1699_v30, %v1622_v29 }
  0x3e   :  { %235 = vmatpush.msra.mxu2 %v107_v58  ;;  %258 = vmatpush.msra.mxu3 %v108_v59  ;;  %v1694_v36 = vld [vmem:[#allocation12 + $0x8c] sm:$0xf0]  ;;  %v2064_v38 = vor.u32 %v1697_v31, %v1624_v32  ;;  %v1692_v39 = vld [vmem:[#allocation12 + $0x84] sm:$0xf]  ;;  %v1600_v40 = vld [vmem:[#allocation12 + $0x90] sm:$0xf0] }
  0x3f   :  { %190 = vmatpush.msra.mxu0 %v101_v4  ;;  %213 = vmatpush.msra.mxu1 %v102_v5  ;;  %v1606_v41 = vld [vmem:[#allocation12 + $0x88] sm:$0xf]  ;;  %v1695_v42 = vld [vmem:[#allocation12 + $0x94] sm:$0xf0]  ;;  %v1693_v43 = vld [vmem:[#allocation12 + $0x8c] sm:$0xf]  ;;  %v2068_v46 = vor.u32 %v1694_v36, %v1598_v35  ;;  %v2070_v47 = vor.u32 %v1692_v39, %v1600_v40 }
  0x40   :  { %236 = vmatpush.msra.mxu2 %v103_v6  ;;  %259 = vmatpush.msra.mxu3 %v104_v7  ;;  %v1608_v44 = vld [vmem:[#allocation12 + $0x98] sm:$0xf0]  ;;  %v100_v45 = vld [vmem:[#allocation8 + $0x8] sm:$0xff]  ;;  %v1582_v48 = vld [vmem:[#allocation12 + $0x60] sm:$0xf]  ;;  %v2074_v50 = vor.u32 %v1695_v42, %v1606_v41  ;;  %s2215_s9 = sld [smem:[#allocation4 + $0x85]] }
  0x41   :  { %663 = vmatpush.bf16.msrb.mxu0 %v2034_v8  ;;  %676 = vmatpush.bf16.msrb.mxu1 %v2036_v9  ;;  %v1690_v49 = vld [vmem:[#allocation12 + $0x6c] sm:$0xf0]  ;;  %v2076_v51 = vor.u32 %v1693_v43, %v1608_v44  ;;  %v1688_v52 = vld [vmem:[#allocation12 + $0x64] sm:$0xf]  ;;  %v1584_v53 = vld [vmem:[#allocation12 + $0x70] sm:$0xf0] }
  0x42   :  { %689 = vmatpush.bf16.msrb.mxu2 %v2038_v12  ;;  %702 = vmatpush.bf16.msrb.mxu3 %v2040_v13  ;;  %v1590_v54 = vld [vmem:[#allocation12 + $0x68] sm:$0xf]  ;;  %v1691_v55 = vld [vmem:[#allocation12 + $0x74] sm:$0xf0]  ;;  %v1689_v56 = vld [vmem:[#allocation12 + $0x6c] sm:$0xf]  ;;  %v2080_v58 = vor.u32 %v1690_v49, %v1582_v48  ;;  %v2082_v59 = vor.u32 %v1688_v52, %v1584_v53 }
  0x43   :  { %237 = vmatmul.f32.vlgmr.msra.gmra.mxu2 %v99_v20  ;;  %260 = vmatmul.f32.vlgmr.msra.gmra.mxu3 %v99_v20  ;;  %v1592_v57 = vld [vmem:[#allocation12 + $0x78] sm:$0xf0]  ;;  %v1566_v60 = vld [vmem:[#allocation12 + $0x40] sm:$0xf]  ;;  %v1686_v61 = vld [vmem:[#allocation12 + $0x4c] sm:$0xf0]  ;;  %v2086_v62 = vor.u32 %v1691_v55, %v1590_v54 }
  0x44   :  { %191 = vmatmul.f32.vlgmr.msra.gmra.mxu0 %v99_v20  ;;  %214 = vmatmul.f32.vlgmr.msra.gmra.mxu1 %v99_v20  ;;  %v2088_v63 = vor.u32 %v1689_v56, %v1592_v57  ;;  %v1684_v0 = vld [vmem:[#allocation12 + $0x44] sm:$0xf]  ;;  %v1568_v1 = vld [vmem:[#allocation12 + $0x50] sm:$0xf0]  ;;  %v1574_v2 = vld [vmem:[#allocation12 + $0x48] sm:$0xf]  ;;  %v2092_v6 = vor.u32 %v1686_v61, %v1566_v60 }
  0x45   :  { %664 = vmatpush.bf16.msrb.mxu0 %v2044_v21  ;;  %677 = vmatpush.bf16.msrb.mxu1 %v2046_v22  ;;  %v1687_v3 = vld [vmem:[#allocation12 + $0x54] sm:$0xf0]  ;;  %v1685_v4 = vld [vmem:[#allocation12 + $0x4c] sm:$0xf]  ;;  %v1576_v5 = vld [vmem:[#allocation12 + $0x58] sm:$0xf0]  ;;  %v2094_v7 = vor.u32 %v1684_v0, %v1568_v1 }
  0x46   :  { %690 = vmatpush.bf16.msrb.mxu2 %v2050_v25  ;;  %703 = vmatpush.bf16.msrb.mxu3 %v2052_v26  ;;  %v1550_v10 = vld [vmem:[#allocation12 + $0x20] sm:$0xf]  ;;  %v1682_v11 = vld [vmem:[#allocation12 + $0x2c] sm:$0xf0]  ;;  %v2098_v14 = vor.u32 %v1687_v3, %v1574_v2  ;;  %v2100_v15 = vor.u32 %v1685_v4, %v1576_v5  ;;  %v1680_v16 = vld [vmem:[#allocation12 + $0x24] sm:$0xf] }
  0x47   :  { %v1552_v17 = vld [vmem:[#allocation12 + $0x30] sm:$0xf0]  ;;  %v1558_v18 = vld [vmem:[#allocation12 + $0x28] sm:$0xf]  ;;  %v1683_v19 = vld [vmem:[#allocation12 + $0x34] sm:$0xf0]  ;;  %v2104_v24 = vor.u32 %v1682_v11, %v1550_v10 }
  0x48   :  { %v1681_v20 = vld [vmem:[#allocation12 + $0x2c] sm:$0xf]  ;;  %v1560_v23 = vld [vmem:[#allocation12 + $0x38] sm:$0xf0]  ;;  %v2106_v27 = vor.u32 %v1680_v16, %v1552_v17  ;;  %v1534_v28 = vld [vmem:[#allocation12] sm:$0xf]  ;;  %v2110_v30 = vor.u32 %v1683_v19, %v1558_v18 }
  0x49   :  { %665 = vmatpush.bf16.msrb.mxu0 %v2056_v33  ;;  %678 = vmatpush.bf16.msrb.mxu1 %v2058_v34  ;;  %v1678_v29 = vld [vmem:[#allocation12 + $0xc] sm:$0xf0]  ;;  %v2112_v31 = vor.u32 %v1681_v20, %v1560_v23  ;;  %v1676_v32 = vld [vmem:[#allocation12 + $0x4] sm:$0xf]  ;;  %v1536_v35 = vld [vmem:[#allocation12 + $0x10] sm:$0xf0]  ;;  %v285_v20 = vlaneseq }
  0x4a   :  { %691 = vmatpush.bf16.msrb.mxu2 %v2062_v37  ;;  %704 = vmatpush.bf16.msrb.mxu3 %v2064_v38  ;;  %v1542_v36 = vld [vmem:[#allocation12 + $0x8] sm:$0xf]  ;;  %v1679_v39 = vld [vmem:[#allocation12 + $0x14] sm:$0xf0]  ;;  %v1677_v40 = vld [vmem:[#allocation12 + $0xc] sm:$0xf]  ;;  %v2116_v42 = vor.u32 %v1678_v29, %v1534_v28  ;;  %v2118_v43 = vor.u32 %v1676_v32, %v1536_v35 }
  0x4b   :  { %240 = vmatmul.f32.gmra.mxu2 %v100_v45  ;;  %263 = vmatmul.f32.gmra.mxu3 %v100_v45  ;;  %v1544_v41 = vld [vmem:[#allocation12 + $0x18] sm:$0xf0]  ;;  %v2122_v44 = vor.u32 %v1679_v39, %v1542_v36  ;;  %v1981_v48 = vmov 0   ;;  %s375_s2 = sshra.s32 %s2204_s4, 3  ;;  %s366_s11 = sand.u32 7, %s2202_s23  ;;  %vm2262_vm0 = vcmp.lt.s32.totalorder %v285_v20, 512 }
  0x4c   :  { %194 = vmatmul.f32.gmra.mxu0 %v100_v45  ;;  %217 = vmatmul.f32.gmra.mxu1 %v100_v45  ;;  %v2124_v45 = vor.u32 %v1677_v40, %v1544_v41  ;;  %v165_v49 = vld [vmem:[#allocation11] sm:$0xf]  ;;  %s387_s12 = sshra.s32 %s2208_s25, 3  ;;  %s1667_s13 = sshll.u32 %s363_s7, 5 }
  0x4d   :  { %666 = vmatpush.bf16.msrb.mxu0 %v2068_v46  ;;  %679 = vmatpush.bf16.msrb.mxu1 %v2070_v47  ;;  %v167_v52 = vperm.slane %v165_v49, 0  ;;  %v168_v53 = vperm.slane %v165_v49, 1  ;;  %s378_s14 = sand.u32 7, %s2204_s4  ;;  %v169_v60 = vperm.slane %v165_v49, 2  ;;  %v170_v61 = vperm.slane %v165_v49, 3  ;;  %s1668_s15 = sshll.u32 %s375_s2, 5 }
  0x4e   :  { %692 = vmatpush.bf16.msrb.mxu2 %v2074_v50  ;;  %705 = vmatpush.bf16.msrb.mxu3 %v2076_v51  ;;  %s390_s0 = sand.u32 7, %s2208_s25  ;;  %s1669_s16 = sshll.u32 %s387_s12, 5 }
  0x4f   :  { %s2224_s20 = sld [smem:[#allocation4 + $0x6]]  ;;  %s2226_s1 = sadd.s32 %s1667_s13, %s366_s11 }
  0x50   :  { %s2228_s21 = sld [smem:[#allocation4 + $0x86]]  ;;  %s2230_s22 = sadd.s32 %s1668_s15, %s378_s14 }
  0x51   :  { %667 = vmatpush.bf16.msrb.mxu0 %v2080_v58  ;;  %680 = vmatpush.bf16.msrb.mxu1 %v2082_v59  ;;  %s2232_s23 = sld [smem:[#allocation4 + $0x7]]  ;;  %s2234_s3 = sadd.s32 %s1669_s16, %s390_s0 }
  0x52   :  { %693 = vmatpush.bf16.msrb.mxu2 %v2086_v62  ;;  %706 = vmatpush.bf16.msrb.mxu3 %v2088_v63  ;;  %2533 = sst [smem:[#allocation23_spill]] %s2234_s3  ;;  %s399_s25 = sshra.s32 %s2212_s30, 3 }
  0x53   :  { %s2236_s4 = sld [smem:[#allocation4 + $0x87]]  ;;  %s411_s26 = sshra.s32 %s2215_s9, 3 }
  0x54   :  { %s402_s27 = sand.u32 7, %s2212_s30  ;;  %s1670_s29 = sshll.u32 %s399_s25, 5 }
  0x55   :  { %668 = vmatpush.bf16.msrb.mxu0 %v2092_v6  ;;  %681 = vmatpush.bf16.msrb.mxu1 %v2094_v7  ;;  %s414_s7 = sand.u32 7, %s2215_s9  ;;  %s423_s2 = sshra.s32 %s2224_s20, 3 }
  0x56   :  { %694 = vmatpush.bf16.msrb.mxu2 %v2098_v14  ;;  %707 = vmatpush.bf16.msrb.mxu3 %v2100_v15  ;;  %s1671_s11 = sshll.u32 %s411_s26, 5  ;;  %s435_s12 = sshra.s32 %s2228_s21, 3 }
  0x57   :  { %s426_s13 = sand.u32 7, %s2224_s20  ;;  %s447_s14 = sshra.s32 %s2232_s23, 3 }
  0x58   :  { %s1672_s15 = sshll.u32 %s423_s2, 5  ;;  %s438_s16 = sand.u32 7, %s2228_s21 }
  0x59   :  { %669 = vmatpush.bf16.msrb.mxu0 %v2104_v24  ;;  %682 = vmatpush.bf16.msrb.mxu1 %v2106_v27  ;;  %s459_s0 = sshra.s32 %s2236_s4, 3  ;;  %s1673_s30 = sshll.u32 %s435_s12, 5 }
  0x5a   :  { %695 = vmatpush.bf16.msrb.mxu2 %v2110_v30  ;;  %708 = vmatpush.bf16.msrb.mxu3 %v2112_v31  ;;  %s450_s9 = sand.u32 7, %s2232_s23  ;;  %s1674_s25 = sshll.u32 %s447_s14, 5 }
  0x5b   :  { %s462_s26 = sand.u32 7, %s2236_s4  ;;  %s1675_s5 = sshll.u32 %s459_s0, 5 }
  0x5c   :  { %s2250_s6 = sadd.s32 %s1670_s29, %s402_s27  ;;  %s2252_s20 = sadd.s32 %s1671_s11, %s414_s7 }
  0x5d   :  { %670 = vmatpush.bf16.msrb.mxu0 %v2116_v42  ;;  %683 = vmatpush.bf16.msrb.mxu1 %v2118_v43  ;;  %s2254_s3 = sadd.s32 %s1672_s15, %s426_s13  ;;  %s2256_s21 = sadd.s32 %s1673_s30, %s438_s16 }
  0x5e   :  { %696 = vmatpush.bf16.msrb.mxu2 %v2122_v44  ;;  %709 = vmatpush.bf16.msrb.mxu3 %v2124_v45  ;;  %s2258_s2 = sadd.s32 %s1674_s25, %s450_s9  ;;  %s2260_s12 = sadd.s32 %s1675_s5, %s462_s26 }
  0x5f   :  { %s283_s23 = scalar_lea.vmem [#allocation2], %s2194_s8  ;;  %s298_s4 = scalar_lea.vmem [#allocation2], %s2196_s17 }
  0x60   :  { %671 = vmatmul.bf16.vlgmr.msrb.gmra.mxu0 %v1981_v48  ;;  %684 = vmatmul.bf16.vlgmr.msrb.gmra.mxu1 %v1981_v48  ;;  %s310_s27 = scalar_lea.vmem [#allocation2], %s2198_s18  ;;  %s322_s5 = scalar_lea.vmem [#allocation2], %s2200_s19 }
  0x61   :  { %757 = vmatpush.bf16.msra.mxu0 %v2034_v8  ;;  %770 = vmatpush.bf16.msra.mxu1 %v2036_v9  ;;  %s334_s8 = scalar_lea.vmem [#allocation2], %s2206_s24  ;;  %s2536_s17 = sld [smem:[#allocation23_spill]] }
  0x62   :  { %697 = vmatmul.bf16.vlgmr.msrb.gmra.mxu2 %v1981_v48  ;;  %710 = vmatmul.bf16.vlgmr.msrb.gmra.mxu3 %v1981_v48  ;;  %s346_s29 = scalar_lea.vmem [#allocation2], %s2210_s28  ;;  %s358_s18 = scalar_lea.vmem [#allocation2], %s2217_s10 }
  0x63   :  { %783 = vmatpush.bf16.msra.mxu2 %v2038_v12  ;;  %796 = vmatpush.bf16.msra.mxu3 %v2040_v13  ;;  %s370_s19 = scalar_lea.vmem [#allocation2], %s2226_s1  ;;  %s382_s24 = scalar_lea.vmem [#allocation2], %s2230_s22 }
  0x64   :  { %s406_s10 = scalar_lea.vmem [#allocation2], %s2250_s6  ;;  %s418_s1 = scalar_lea.vmem [#allocation2], %s2252_s20 }
  0x65   :  { %758 = vmatpush.bf16.msra.mxu0 %v2044_v21  ;;  %771 = vmatpush.bf16.msra.mxu1 %v2046_v22  ;;  %s430_s22 = scalar_lea.vmem [#allocation2], %s2254_s3  ;;  %s442_s7 = scalar_lea.vmem [#allocation2], %s2256_s21 }
  0x66   :  { %s454_s6 = scalar_lea.vmem [#allocation2], %s2258_s2  ;;  %s466_s11 = scalar_lea.vmem [#allocation2], %s2260_s12 }
  0x67   :  { %784 = vmatpush.bf16.msra.mxu2 %v2050_v25  ;;  %797 = vmatpush.bf16.msra.mxu3 %v2052_v26  ;;  %s394_s28 = scalar_lea.vmem [#allocation2], %s2536_s17  ;;  %s1982_s3 = smov [#allocation15]  }
  0x68   :  { %s1410_s13 = sshll.u32 %s1982_s3, 4  ;;  %s2537_s0 = sld [smem:[#allocation25_spill]]  ;;  %s1411_s13 = int_to_ptr.vmem [resolvable:$true] %s1410_s13 }
  0x69   :  { %759 = vmatpush.bf16.msra.mxu0 %v2056_v33  ;;  %772 = vmatpush.bf16.msra.mxu1 %v2058_v34  ;;  %s1983_s30 = smov [#allocation14]   ;;  %s2538_s20 = sld [smem:[#allocation24_spill]] }
  0x6a   :  { %s1399_s9 = sshll.u32 %s1983_s30, 4  ;;  %s1400_s9 = int_to_ptr.vmem [resolvable:$true] %s1399_s9 }
  0x6b   :  { %785 = vmatpush.bf16.msra.mxu2 %v2062_v37  ;;  %798 = vmatpush.bf16.msra.mxu3 %v2064_v38 }
  0x6d   :  { %760 = vmatpush.bf16.msra.mxu0 %v2068_v46  ;;  %773 = vmatpush.bf16.msra.mxu1 %v2070_v47 }
  0x6e   :  { %s1412_s16 = sshll.u32 %s2537_s0, 4  ;;  %s1413_s16 = int_to_ptr.hbm [resolvable:$true] %s1412_s16 }
  0x6f   :  { %786 = vmatpush.bf16.msra.mxu2 %v2074_v50  ;;  %799 = vmatpush.bf16.msra.mxu3 %v2076_v51  ;;  %s1401_s21 = sshll.u32 %s2538_s20, 4  ;;  %s1402_s21 = int_to_ptr.hbm [resolvable:$true] %s1401_s21 }
  0x71   :  { %761 = vmatpush.bf16.msra.mxu0 %v2080_v58  ;;  %774 = vmatpush.bf16.msra.mxu1 %v2082_v59 }
  0x73   :  { %787 = vmatpush.bf16.msra.mxu2 %v2086_v62  ;;  %800 = vmatpush.bf16.msra.mxu3 %v2088_v63 }
  0x75   :  { %762 = vmatpush.bf16.msra.mxu0 %v2092_v6  ;;  %775 = vmatpush.bf16.msra.mxu1 %v2094_v7 }
  0x77   :  { %788 = vmatpush.bf16.msra.mxu2 %v2098_v14  ;;  %801 = vmatpush.bf16.msra.mxu3 %v2100_v15 }
  0x79   :  { %763 = vmatpush.bf16.msra.mxu0 %v2104_v24  ;;  %776 = vmatpush.bf16.msra.mxu1 %v2106_v27 }
  0x7b   :  { %789 = vmatpush.bf16.msra.mxu2 %v2110_v30  ;;  %802 = vmatpush.bf16.msra.mxu3 %v2112_v31 }
  0x7d   :  { %764 = vmatpush.bf16.msra.mxu0 %v2116_v42  ;;  %777 = vmatpush.bf16.msra.mxu1 %v2118_v43 }
  0x7f   :  { %790 = vmatpush.bf16.msra.mxu2 %v2122_v44  ;;  %803 = vmatpush.bf16.msra.mxu3 %v2124_v45 }
  0x81   :  { %848 = vmatpush.bf16.msrb.mxu0 %v2034_v8  ;;  %861 = vmatpush.bf16.msrb.mxu1 %v2036_v9 }
  0x83   :  { %874 = vmatpush.bf16.msrb.mxu2 %v2038_v12  ;;  %887 = vmatpush.bf16.msrb.mxu3 %v2040_v13 }
  0x85   :  { %849 = vmatpush.bf16.msrb.mxu0 %v2044_v21  ;;  %862 = vmatpush.bf16.msrb.mxu1 %v2046_v22 }
  0x87   :  { %875 = vmatpush.bf16.msrb.mxu2 %v2050_v25  ;;  %888 = vmatpush.bf16.msrb.mxu3 %v2052_v26 }
  0x89   :  { %850 = vmatpush.bf16.msrb.mxu0 %v2056_v33  ;;  %863 = vmatpush.bf16.msrb.mxu1 %v2058_v34 }
  0x8b   :  { %876 = vmatpush.bf16.msrb.mxu2 %v2062_v37  ;;  %889 = vmatpush.bf16.msrb.mxu3 %v2064_v38 }
  0x8d   :  { %851 = vmatpush.bf16.msrb.mxu0 %v2068_v46  ;;  %864 = vmatpush.bf16.msrb.mxu1 %v2070_v47 }
  0x8f   :  { %877 = vmatpush.bf16.msrb.mxu2 %v2074_v50  ;;  %890 = vmatpush.bf16.msrb.mxu3 %v2076_v51 }
  0x91   :  { %852 = vmatpush.bf16.msrb.mxu0 %v2080_v58  ;;  %865 = vmatpush.bf16.msrb.mxu1 %v2082_v59 }
  0x93   :  { %878 = vmatpush.bf16.msrb.mxu2 %v2086_v62  ;;  %891 = vmatpush.bf16.msrb.mxu3 %v2088_v63 }
  0x95   :  { %853 = vmatpush.bf16.msrb.mxu0 %v2092_v6  ;;  %866 = vmatpush.bf16.msrb.mxu1 %v2094_v7 }
  0x97   :  { %879 = vmatpush.bf16.msrb.mxu2 %v2098_v14  ;;  %892 = vmatpush.bf16.msrb.mxu3 %v2100_v15 }
  0x99   :  { %854 = vmatpush.bf16.msrb.mxu0 %v2104_v24  ;;  %867 = vmatpush.bf16.msrb.mxu1 %v2106_v27 }
  0x9b   :  { %880 = vmatpush.bf16.msrb.mxu2 %v2110_v30  ;;  %893 = vmatpush.bf16.msrb.mxu3 %v2112_v31 }
  0x9d   :  { %855 = vmatpush.bf16.msrb.mxu0 %v2116_v42  ;;  %868 = vmatpush.bf16.msrb.mxu1 %v2118_v43 }
  0x9f   :  { %881 = vmatpush.bf16.msrb.mxu2 %v2122_v44  ;;  %894 = vmatpush.bf16.msrb.mxu3 %v2124_v45 }
  0xc1   :  { %v192_v54 = vpop.f32.mrf.mxu0  ;;  %v215_v55 = vpop.f32.mrf.mxu1 }
  0xc2   :  { %v193_v56 = vadd.f32 %v192_v54, %v167_v52  ;;  %v216_v57 = vadd.f32 %v215_v55, %v168_v53 }
  0xc4   :  { %267 = vst [vmem:[#allocation2] sm:$0xff] %v193_v56 }
  0xc5   :  { %268 = vst [vmem:[#allocation2 + $0x8] sm:$0xff] %v216_v57 }
  0xc6   :  { %v238_v0 = vpop.f32.mrf.mxu2  ;;  %v261_v1 = vpop.f32.mrf.mxu3 }
  0xc7   :  { %v239_v2 = vadd.f32 %v238_v0, %v169_v60  ;;  %v262_v3 = vadd.f32 %v261_v1, %v170_v61 }
  0xc9   :  { %269 = vst [vmem:[#allocation2 + $0x10] sm:$0xff] %v239_v2  ;;  %v195_v4 = vpop.f32.mrf.mxu0  ;;  %v218_v5 = vpop.f32.mrf.mxu1 }
  0xca   :  { %270 = vst [vmem:[#allocation2 + $0x18] sm:$0xff] %v262_v3  ;;  %v196_v10 = vadd.f32 %v195_v4, %v167_v52  ;;  %v219_v11 = vadd.f32 %v218_v5, %v168_v53 }
  0xcc   :  { %271 = vst [vmem:[#allocation2 + $0x20] sm:$0xff] %v196_v10 }
  0xcd   :  { %272 = vst [vmem:[#allocation2 + $0x28] sm:$0xff] %v219_v11 }
  0xce   :  { %v241_v16 = vpop.f32.mrf.mxu2  ;;  %v264_v17 = vpop.f32.mrf.mxu3 }
  0xcf   :  { %v242_v18 = vadd.f32 %v241_v16, %v169_v60  ;;  %v265_v19 = vadd.f32 %v264_v17, %v170_v61 }
  0xd1   :  { %273 = vst [vmem:[#allocation2 + $0x30] sm:$0xff] %v242_v18 }
  0xd2   :  { %274 = vst [vmem:[#allocation2 + $0x38] sm:$0xff] %v265_v19 }
  0xd9   :  { %v284_v28 = vld [vmem:[%s283_s23] ss:$8 sm:$0xf] }
  0xda   :  { %v299_v29 = vld [vmem:[%s298_s4] ss:$8 sm:$0xf]  ;;  %289 = vst.msk [vmem:[#allocation3] ss:$2 sm:$0xf] %vm2262_vm0, %v284_v28 }
  0xdb   :  { %v311_v32 = vld [vmem:[%s310_s27] ss:$8 sm:$0xf]  ;;  %301 = vst.msk [vmem:[#allocation3 + $0x1] ss:$2 sm:$0xf] %vm2262_vm0, %v299_v29 }
  0xdc   :  { %v323_v35 = vld [vmem:[%s322_s5] ss:$8 sm:$0xf]  ;;  %313 = vst.msk [vmem:[#allocation3 + $0x8] ss:$2 sm:$0xf] %vm2262_vm0, %v311_v32 }
  0xdd   :  { %v335_v36 = vld [vmem:[%s334_s8] ss:$8 sm:$0xf]  ;;  %325 = vst.msk [vmem:[#allocation3 + $0x9] ss:$2 sm:$0xf] %vm2262_vm0, %v323_v35  ;;  %v672_v40 = vpop.f32.mrf.mxu0  ;;  %v685_v41 = vpop.f32.mrf.mxu1 }
  0xde   :  { %v347_v39 = vld [vmem:[%s346_s29] ss:$8 sm:$0xf]  ;;  %337 = vst.msk [vmem:[#allocation3 + $0x10] ss:$2 sm:$0xf] %vm2262_vm0, %v335_v36 }
  0xdf   :  { %v359_v48 = vld [vmem:[%s358_s18] ss:$8 sm:$0xf]  ;;  %349 = vst.msk [vmem:[#allocation3 + $0x11] ss:$2 sm:$0xf] %vm2262_vm0, %v347_v39 }
  0xe0   :  { %v371_v49 = vld [vmem:[%s370_s19] ss:$8 sm:$0xf]  ;;  %361 = vst.msk [vmem:[#allocation3 + $0x18] ss:$2 sm:$0xf] %vm2262_vm0, %v359_v48 }
  0xe1   :  { %v383_v52 = vld [vmem:[%s382_s24] ss:$8 sm:$0xf]  ;;  %373 = vst.msk [vmem:[#allocation3 + $0x19] ss:$2 sm:$0xf] %vm2262_vm0, %v371_v49 }
  0xe2   :  { %v395_v53 = vld [vmem:[%s394_s28] ss:$8 sm:$0xf]  ;;  %385 = vst.msk [vmem:[#allocation3 + $0x20] ss:$2 sm:$0xf] %vm2262_vm0, %v383_v52 }
  0xe3   :  { %v407_v54 = vld [vmem:[%s406_s10] ss:$8 sm:$0xf]  ;;  %397 = vst.msk [vmem:[#allocation3 + $0x21] ss:$2 sm:$0xf] %vm2262_vm0, %v395_v53 }
  0xe4   :  { %v419_v55 = vld [vmem:[%s418_s1] ss:$8 sm:$0xf]  ;;  %409 = vst.msk [vmem:[#allocation3 + $0x28] ss:$2 sm:$0xf] %vm2262_vm0, %v407_v54 }
  0xe5   :  { %v431_v56 = vld [vmem:[%s430_s22] ss:$8 sm:$0xf]  ;;  %v698_v57 = vpop.f32.mrf.mxu2  ;;  %v711_v60 = vpop.f32.mrf.mxu3  ;;  %421 = vst.msk [vmem:[#allocation3 + $0x29] ss:$2 sm:$0xf] %vm2262_vm0, %v419_v55 }
  0xe6   :  { %v443_v61 = vld [vmem:[%s442_s7] ss:$8 sm:$0xf]  ;;  %v674_v0 = vpop.f32.mrf.mxu0  ;;  %v687_v1 = vpop.f32.mrf.mxu1  ;;  %433 = vst.msk [vmem:[#allocation3 + $0x30] ss:$2 sm:$0xf] %vm2262_vm0, %v431_v56 }
  0xe7   :  { %v455_v2 = vld [vmem:[%s454_s6] ss:$8 sm:$0xf]  ;;  %445 = vst.msk [vmem:[#allocation3 + $0x31] ss:$2 sm:$0xf] %vm2262_vm0, %v443_v61 }
  0xe8   :  { %v467_v3 = vld [vmem:[%s466_s11] ss:$8 sm:$0xf]  ;;  %457 = vst.msk [vmem:[#allocation3 + $0x38] ss:$2 sm:$0xf] %vm2262_vm0, %v455_v2 }
  0xe9   :  { %v719_v4 = vrot.slane %v685_v41, 6  ;;  %v720_v5 = vrot.slane %v698_v57, 4  ;;  %469 = vst.msk [vmem:[#allocation3 + $0x39] ss:$2 sm:$0xf] %vm2262_vm0, %v467_v3  ;;  %v721_v10 = vrot.slane %v711_v60, 2 }
  0xea   :  { %v502_v17 = vld [vmem:[#allocation3] sm:$0xff] }
  0xeb   :  { %v723_v11 = vsel %vm722_vm1, %v672_v40, %v719_v4  ;;  %v725_v16 = vsel %vm724_vm2, %v720_v5, %v721_v10 }
  0xec   :  { %v727_v18 = vsel %vm726_vm3, %v723_v11, %v725_v16 }
  0xed   :  { %v700_v19 = vpop.f32.mrf.mxu2  ;;  %v713_v20 = vpop.f32.mrf.mxu3  ;;  %v729_v28 = vadd.f32 %v727_v18, %v502_v17 }
  0xef   :  { %v730_v29 = vmul.f32 0.5, %v729_v28  ;;  %v735_v32 = vrot.slane %v729_v28, 2  ;;  %v744_v36 = vrot.slane %v729_v28, 6  ;;  %v741_v23 = vrot.slane %v729_v28, 4 }
  0xf1   :  { %1722 = vtanh.f32 %v730_v29  ;;  %v737_v35 = vmul.f32 0.5, %v735_v32  ;;  %v746_v39 = vmul.f32 0.5, %v744_v36  ;;  %v755_v32 = vld [vmem:[#allocation3 + $0x8] sm:$0xff] }
  0xf3   :  { %1724 = vtanh.f32 %v737_v35 }
  0xf4   :  { %1726 = vtanh.f32 %v741_v23 }
  0xf5   :  { %1728 = vtanh.f32 %v746_v39 }
  0xf7   :  { %v1723_v41 = vpop.eup %1722 }
  0xf8   :  { %v732_v48 = vmul.f32 0.5, %v1723_v41 }
  0xf9   :  { %v1725_v40 = vpop.eup %1724 }
  0xfa   :  { %v733_v49 = vadd.f32 0.5, %v732_v48  ;;  %v739_v52 = vmul.f32 0.5, %v1725_v40  ;;  %v1727_v54 = vpop.eup %1726 }
  0xfb   :  { %v1729_v57 = vpop.eup %1728 }
  0xfc   :  { %v740_v53 = vadd.f32 0.5, %v739_v52  ;;  %v751_v56 = vmul.f32 %v1727_v54, %v733_v49  ;;  %v748_v61 = vmul.f32 0.5, %v1729_v57 }
  0xfe   :  { %v750_v55 = vmul.f32 0.0, %v740_v53  ;;  %v749_v0 = vadd.f32 0.5, %v748_v61 }
 0x100   :  { %v2317_v60 = vadd.f32 %v751_v56, %v750_v55 }
 0x102   :  { %1730 = vtanh.f32 %v2317_v60 }
 0x108   :  { %v1731_v1 = vpop.eup %1730 }
 0x109   :  { %v754_v2 = vmul.f32 %v1731_v1, %v749_v0 }
 0x10b   :  { %v756_v3 = vpack.c.bf16 %v754_v2, %v754_v2 }
 0x10d   :  { %765 = vmatmul.bf16.vlgmr.msra.gmra.mxu0 %v756_v3  ;;  %778 = vmatmul.bf16.vlgmr.msra.gmra.mxu1 %v756_v3 }
 0x10e   :  { %791 = vmatmul.bf16.vlgmr.msra.gmra.mxu2 %v756_v3  ;;  %804 = vmatmul.bf16.vlgmr.msra.gmra.mxu3 %v756_v3 }
 0x10f   :  { %939 = vmatpush.bf16.msra.mxu0 %v2034_v8  ;;  %952 = vmatpush.bf16.msra.mxu1 %v2036_v9 }
 0x110   :  { %965 = vmatpush.bf16.msra.mxu2 %v2038_v12  ;;  %978 = vmatpush.bf16.msra.mxu3 %v2040_v13 }
 0x113   :  { %940 = vmatpush.bf16.msra.mxu0 %v2044_v21  ;;  %953 = vmatpush.bf16.msra.mxu1 %v2046_v22 }
 0x114   :  { %966 = vmatpush.bf16.msra.mxu2 %v2050_v25  ;;  %979 = vmatpush.bf16.msra.mxu3 %v2052_v26 }
 0x117   :  { %941 = vmatpush.bf16.msra.mxu0 %v2056_v33  ;;  %954 = vmatpush.bf16.msra.mxu1 %v2058_v34 }
 0x118   :  { %967 = vmatpush.bf16.msra.mxu2 %v2062_v37  ;;  %980 = vmatpush.bf16.msra.mxu3 %v2064_v38 }
 0x11b   :  { %942 = vmatpush.bf16.msra.mxu0 %v2068_v46  ;;  %955 = vmatpush.bf16.msra.mxu1 %v2070_v47 }
 0x11c   :  { %968 = vmatpush.bf16.msra.mxu2 %v2074_v50  ;;  %981 = vmatpush.bf16.msra.mxu3 %v2076_v51 }
 0x11f   :  { %943 = vmatpush.bf16.msra.mxu0 %v2080_v58  ;;  %956 = vmatpush.bf16.msra.mxu1 %v2082_v59 }
 0x120   :  { %969 = vmatpush.bf16.msra.mxu2 %v2086_v62  ;;  %982 = vmatpush.bf16.msra.mxu3 %v2088_v63 }
 0x123   :  { %944 = vmatpush.bf16.msra.mxu0 %v2092_v6  ;;  %957 = vmatpush.bf16.msra.mxu1 %v2094_v7 }
 0x124   :  { %970 = vmatpush.bf16.msra.mxu2 %v2098_v14  ;;  %983 = vmatpush.bf16.msra.mxu3 %v2100_v15 }
 0x127   :  { %945 = vmatpush.bf16.msra.mxu0 %v2104_v24  ;;  %958 = vmatpush.bf16.msra.mxu1 %v2106_v27 }
 0x128   :  { %971 = vmatpush.bf16.msra.mxu2 %v2110_v30  ;;  %984 = vmatpush.bf16.msra.mxu3 %v2112_v31 }
 0x12b   :  { %946 = vmatpush.bf16.msra.mxu0 %v2116_v42  ;;  %959 = vmatpush.bf16.msra.mxu1 %v2118_v43 }
 0x12c   :  { %972 = vmatpush.bf16.msra.mxu2 %v2122_v44  ;;  %985 = vmatpush.bf16.msra.mxu3 %v2124_v45 }
 0x18a   :  { %v766_v4 = vpop.f32.mrf.mxu0  ;;  %v779_v5 = vpop.f32.mrf.mxu1 }
 0x18b   :  { %v813_v10 = vrot.slane %v779_v5, 6 }
 0x18d   :  { %v816_v28 = vsel %vm722_vm1, %v766_v4, %v813_v10 }
 0x191   :  { %v792_v11 = vpop.f32.mrf.mxu2  ;;  %v805_v16 = vpop.f32.mrf.mxu3 }
 0x192   :  { %v814_v17 = vrot.slane %v792_v11, 4  ;;  %v815_v18 = vrot.slane %v805_v16, 2  ;;  %v768_v19 = vpop.f32.mrf.mxu0  ;;  %v781_v20 = vpop.f32.mrf.mxu1 }
 0x194   :  { %v817_v29 = vsel %vm724_vm2, %v814_v17, %v815_v18 }
 0x195   :  { %v818_v35 = vsel %vm726_vm3, %v816_v28, %v817_v29 }
 0x196   :  { %v820_v36 = vadd.f32 %v818_v35, %v755_v32 }
 0x198   :  { %v821_v23 = vmul.f32 0.5, %v820_v36  ;;  %v826_v39 = vrot.slane %v820_v36, 2  ;;  %v835_v49 = vrot.slane %v820_v36, 6  ;;  %v832_v52 = vrot.slane %v820_v36, 4 }
 0x199   :  { %v794_v41 = vpop.f32.mrf.mxu2  ;;  %v807_v48 = vpop.f32.mrf.mxu3 }
 0x19a   :  { %1732 = vtanh.f32 %v821_v23  ;;  %v828_v40 = vmul.f32 0.5, %v826_v39  ;;  %v837_v53 = vmul.f32 0.5, %v835_v49  ;;  %v846_v48 = vld [vmem:[#allocation3 + $0x10] sm:$0xff] }
 0x19c   :  { %1734 = vtanh.f32 %v828_v40 }
 0x19d   :  { %1736 = vtanh.f32 %v832_v52 }
 0x19e   :  { %1738 = vtanh.f32 %v837_v53 }
 0x1a0   :  { %v1733_v54 = vpop.eup %1732 }
 0x1a1   :  { %v823_v55 = vmul.f32 0.5, %v1733_v54 }
 0x1a2   :  { %v1735_v56 = vpop.eup %1734 }
 0x1a3   :  { %v824_v57 = vadd.f32 0.5, %v823_v55  ;;  %v830_v61 = vmul.f32 0.5, %v1735_v56  ;;  %v1737_v1 = vpop.eup %1736 }
 0x1a4   :  { %v1739_v4 = vpop.eup %1738 }
 0x1a5   :  { %v831_v0 = vadd.f32 0.5, %v830_v61  ;;  %v842_v3 = vmul.f32 %v1737_v1, %v824_v57  ;;  %v839_v10 = vmul.f32 0.5, %v1739_v4 }
 0x1a7   :  { %v841_v2 = vmul.f32 %v831_v0, %v2317_v60  ;;  %v840_v11 = vadd.f32 0.5, %v839_v10 }
 0x1a9   :  { %v2356_v5 = vadd.f32 %v842_v3, %v841_v2 }
 0x1ab   :  { %1740 = vtanh.f32 %v2356_v5 }
 0x1b1   :  { %v1741_v16 = vpop.eup %1740 }
 0x1b2   :  { %v845_v17 = vmul.f32 %v1741_v16, %v840_v11 }
 0x1b4   :  { %v847_v18 = vpack.c.bf16 %v845_v17, %v845_v17 }
 0x1b6   :  { %856 = vmatmul.bf16.vlgmr.msrb.gmra.mxu0 %v847_v18  ;;  %869 = vmatmul.bf16.vlgmr.msrb.gmra.mxu1 %v847_v18 }
 0x1b7   :  { %882 = vmatmul.bf16.vlgmr.msrb.gmra.mxu2 %v847_v18  ;;  %895 = vmatmul.bf16.vlgmr.msrb.gmra.mxu3 %v847_v18 }
 0x1b8   :  { %1030 = vmatpush.bf16.msrb.mxu0 %v2034_v8  ;;  %1043 = vmatpush.bf16.msrb.mxu1 %v2036_v9 }
 0x1b9   :  { %1056 = vmatpush.bf16.msrb.mxu2 %v2038_v12  ;;  %1069 = vmatpush.bf16.msrb.mxu3 %v2040_v13 }
 0x1bc   :  { %1031 = vmatpush.bf16.msrb.mxu0 %v2044_v21  ;;  %1044 = vmatpush.bf16.msrb.mxu1 %v2046_v22 }
 0x1bd   :  { %1057 = vmatpush.bf16.msrb.mxu2 %v2050_v25  ;;  %1070 = vmatpush.bf16.msrb.mxu3 %v2052_v26 }
 0x1c0   :  { %1032 = vmatpush.bf16.msrb.mxu0 %v2056_v33  ;;  %1045 = vmatpush.bf16.msrb.mxu1 %v2058_v34 }
 0x1c1   :  { %1058 = vmatpush.bf16.msrb.mxu2 %v2062_v37  ;;  %1071 = vmatpush.bf16.msrb.mxu3 %v2064_v38 }
 0x1c4   :  { %1033 = vmatpush.bf16.msrb.mxu0 %v2068_v46  ;;  %1046 = vmatpush.bf16.msrb.mxu1 %v2070_v47 }
 0x1c5   :  { %1059 = vmatpush.bf16.msrb.mxu2 %v2074_v50  ;;  %1072 = vmatpush.bf16.msrb.mxu3 %v2076_v51 }
 0x1c8   :  { %1034 = vmatpush.bf16.msrb.mxu0 %v2080_v58  ;;  %1047 = vmatpush.bf16.msrb.mxu1 %v2082_v59 }
 0x1c9   :  { %1060 = vmatpush.bf16.msrb.mxu2 %v2086_v62  ;;  %1073 = vmatpush.bf16.msrb.mxu3 %v2088_v63 }
 0x1cc   :  { %1035 = vmatpush.bf16.msrb.mxu0 %v2092_v6  ;;  %1048 = vmatpush.bf16.msrb.mxu1 %v2094_v7 }
 0x1cd   :  { %1061 = vmatpush.bf16.msrb.mxu2 %v2098_v14  ;;  %1074 = vmatpush.bf16.msrb.mxu3 %v2100_v15 }
 0x1d0   :  { %1036 = vmatpush.bf16.msrb.mxu0 %v2104_v24  ;;  %1049 = vmatpush.bf16.msrb.mxu1 %v2106_v27 }
 0x1d1   :  { %1062 = vmatpush.bf16.msrb.mxu2 %v2110_v30  ;;  %1075 = vmatpush.bf16.msrb.mxu3 %v2112_v31 }
 0x1d4   :  { %1037 = vmatpush.bf16.msrb.mxu0 %v2116_v42  ;;  %1050 = vmatpush.bf16.msrb.mxu1 %v2118_v43 }
 0x1d5   :  { %1063 = vmatpush.bf16.msrb.mxu2 %v2122_v44  ;;  %1076 = vmatpush.bf16.msrb.mxu3 %v2124_v45 }
 0x233   :  { %v857_v60 = vpop.f32.mrf.mxu0  ;;  %v870_v19 = vpop.f32.mrf.mxu1 }
 0x234   :  { %v904_v20 = vrot.slane %v870_v19, 6 }
 0x236   :  { %v907_v39 = vsel %vm722_vm1, %v857_v60, %v904_v20 }
 0x23a   :  { %v883_v28 = vpop.f32.mrf.mxu2  ;;  %v896_v29 = vpop.f32.mrf.mxu3 }
 0x23b   :  { %v905_v32 = vrot.slane %v883_v28, 4  ;;  %v906_v35 = vrot.slane %v896_v29, 2  ;;  %v859_v36 = vpop.f32.mrf.mxu0  ;;  %v872_v23 = vpop.f32.mrf.mxu1 }
 0x23d   :  { %v908_v41 = vsel %vm724_vm2, %v905_v32, %v906_v35 }
 0x23e   :  { %v909_v40 = vsel %vm726_vm3, %v907_v39, %v908_v41 }
 0x23f   :  { %v911_v49 = vadd.f32 %v909_v40, %v846_v48 }
 0x241   :  { %v912_v52 = vmul.f32 0.5, %v911_v49  ;;  %v917_v53 = vrot.slane %v911_v49, 2  ;;  %v926_v57 = vrot.slane %v911_v49, 6  ;;  %v923_v61 = vrot.slane %v911_v49, 4 }
 0x242   :  { %v885_v54 = vpop.f32.mrf.mxu2  ;;  %v898_v55 = vpop.f32.mrf.mxu3 }
 0x243   :  { %1742 = vtanh.f32 %v912_v52  ;;  %v919_v56 = vmul.f32 0.5, %v917_v53  ;;  %v928_v0 = vmul.f32 0.5, %v926_v57  ;;  %v937_v55 = vld [vmem:[#allocation3 + $0x18] sm:$0xff] }
 0x245   :  { %1744 = vtanh.f32 %v919_v56 }
 0x246   :  { %1746 = vtanh.f32 %v923_v61 }
 0x247   :  { %1748 = vtanh.f32 %v928_v0 }
 0x249   :  { %v1743_v1 = vpop.eup %1742 }
 0x24a   :  { %v914_v2 = vmul.f32 0.5, %v1743_v1 }
 0x24b   :  { %v1745_v3 = vpop.eup %1744 }
 0x24c   :  { %v915_v4 = vadd.f32 0.5, %v914_v2  ;;  %v921_v10 = vmul.f32 0.5, %v1745_v3  ;;  %v1747_v16 = vpop.eup %1746 }
 0x24d   :  { %v1749_v60 = vpop.eup %1748 }
 0x24e   :  { %v922_v11 = vadd.f32 0.5, %v921_v10  ;;  %v933_v18 = vmul.f32 %v1747_v16, %v915_v4  ;;  %v930_v20 = vmul.f32 0.5, %v1749_v60 }
 0x250   :  { %v932_v17 = vmul.f32 %v922_v11, %v2356_v5  ;;  %v931_v28 = vadd.f32 0.5, %v930_v20 }
 0x252   :  { %v2395_v19 = vadd.f32 %v933_v18, %v932_v17 }
 0x254   :  { %1750 = vtanh.f32 %v2395_v19 }
 0x25a   :  { %v1751_v29 = vpop.eup %1750 }
 0x25b   :  { %v936_v32 = vmul.f32 %v1751_v29, %v931_v28 }
 0x25d   :  { %v938_v35 = vpack.c.bf16 %v936_v32, %v936_v32 }
 0x25f   :  { %947 = vmatmul.bf16.vlgmr.msra.gmra.mxu0 %v938_v35  ;;  %960 = vmatmul.bf16.vlgmr.msra.gmra.mxu1 %v938_v35 }
 0x260   :  { %973 = vmatmul.bf16.vlgmr.msra.gmra.mxu2 %v938_v35  ;;  %986 = vmatmul.bf16.vlgmr.msra.gmra.mxu3 %v938_v35 }
 0x261   :  { %1121 = vmatpush.bf16.msra.mxu0 %v2034_v8  ;;  %1134 = vmatpush.bf16.msra.mxu1 %v2036_v9 }
 0x262   :  { %1147 = vmatpush.bf16.msra.mxu2 %v2038_v12  ;;  %1160 = vmatpush.bf16.msra.mxu3 %v2040_v13 }
 0x265   :  { %1122 = vmatpush.bf16.msra.mxu0 %v2044_v21  ;;  %1135 = vmatpush.bf16.msra.mxu1 %v2046_v22 }
 0x266   :  { %1148 = vmatpush.bf16.msra.mxu2 %v2050_v25  ;;  %1161 = vmatpush.bf16.msra.mxu3 %v2052_v26 }
 0x269   :  { %1123 = vmatpush.bf16.msra.mxu0 %v2056_v33  ;;  %1136 = vmatpush.bf16.msra.mxu1 %v2058_v34 }
 0x26a   :  { %1149 = vmatpush.bf16.msra.mxu2 %v2062_v37  ;;  %1162 = vmatpush.bf16.msra.mxu3 %v2064_v38 }
 0x26d   :  { %1124 = vmatpush.bf16.msra.mxu0 %v2068_v46  ;;  %1137 = vmatpush.bf16.msra.mxu1 %v2070_v47 }
 0x26e   :  { %1150 = vmatpush.bf16.msra.mxu2 %v2074_v50  ;;  %1163 = vmatpush.bf16.msra.mxu3 %v2076_v51 }
 0x271   :  { %1125 = vmatpush.bf16.msra.mxu0 %v2080_v58  ;;  %1138 = vmatpush.bf16.msra.mxu1 %v2082_v59 }
 0x272   :  { %1151 = vmatpush.bf16.msra.mxu2 %v2086_v62  ;;  %1164 = vmatpush.bf16.msra.mxu3 %v2088_v63 }
 0x275   :  { %1126 = vmatpush.bf16.msra.mxu0 %v2092_v6  ;;  %1139 = vmatpush.bf16.msra.mxu1 %v2094_v7 }
 0x276   :  { %1152 = vmatpush.bf16.msra.mxu2 %v2098_v14  ;;  %1165 = vmatpush.bf16.msra.mxu3 %v2100_v15 }
 0x279   :  { %1127 = vmatpush.bf16.msra.mxu0 %v2104_v24  ;;  %1140 = vmatpush.bf16.msra.mxu1 %v2106_v27 }
 0x27a   :  { %1153 = vmatpush.bf16.msra.mxu2 %v2110_v30  ;;  %1166 = vmatpush.bf16.msra.mxu3 %v2112_v31 }
 0x27d   :  { %1128 = vmatpush.bf16.msra.mxu0 %v2116_v42  ;;  %1141 = vmatpush.bf16.msra.mxu1 %v2118_v43 }
 0x27e   :  { %1154 = vmatpush.bf16.msra.mxu2 %v2122_v44  ;;  %1167 = vmatpush.bf16.msra.mxu3 %v2124_v45 }
 0x2dc   :  { %v948_v5 = vpop.f32.mrf.mxu0  ;;  %v961_v36 = vpop.f32.mrf.mxu1 }
 0x2dd   :  { %v995_v23 = vrot.slane %v961_v36, 6 }
 0x2df   :  { %v998_v53 = vsel %vm722_vm1, %v948_v5, %v995_v23 }
 0x2e3   :  { %v974_v39 = vpop.f32.mrf.mxu2  ;;  %v987_v41 = vpop.f32.mrf.mxu3 }
 0x2e4   :  { %v996_v48 = vrot.slane %v974_v39, 4  ;;  %v997_v40 = vrot.slane %v987_v41, 2  ;;  %v950_v49 = vpop.f32.mrf.mxu0  ;;  %v963_v52 = vpop.f32.mrf.mxu1 }
 0x2e6   :  { %v999_v54 = vsel %vm724_vm2, %v996_v48, %v997_v40 }
 0x2e7   :  { %v1000_v56 = vsel %vm726_vm3, %v998_v53, %v999_v54 }
 0x2e8   :  { %v1002_v57 = vadd.f32 %v1000_v56, %v937_v55 }
 0x2ea   :  { %v1003_v61 = vmul.f32 0.5, %v1002_v57  ;;  %v1008_v0 = vrot.slane %v1002_v57, 2  ;;  %v1017_v4 = vrot.slane %v1002_v57, 6  ;;  %v1014_v10 = vrot.slane %v1002_v57, 4 }
 0x2eb   :  { %v976_v1 = vpop.f32.mrf.mxu2  ;;  %v989_v2 = vpop.f32.mrf.mxu3 }
 0x2ec   :  { %1752 = vtanh.f32 %v1003_v61  ;;  %v1010_v3 = vmul.f32 0.5, %v1008_v0  ;;  %v1019_v11 = vmul.f32 0.5, %v1017_v4  ;;  %v1028_v2 = vld [vmem:[#allocation3 + $0x20] sm:$0xff] }
 0x2ee   :  { %1754 = vtanh.f32 %v1010_v3 }
 0x2ef   :  { %1756 = vtanh.f32 %v1014_v10 }
 0x2f0   :  { %1758 = vtanh.f32 %v1019_v11 }
 0x2f2   :  { %v1753_v16 = vpop.eup %1752 }
 0x2f3   :  { %v1005_v17 = vmul.f32 0.5, %v1753_v16 }
 0x2f4   :  { %v1755_v18 = vpop.eup %1754 }
 0x2f5   :  { %v1006_v60 = vadd.f32 0.5, %v1005_v17  ;;  %v1012_v20 = vmul.f32 0.5, %v1755_v18  ;;  %v1757_v29 = vpop.eup %1756 }
 0x2f6   :  { %v1759_v5 = vpop.eup %1758 }
 0x2f7   :  { %v1013_v28 = vadd.f32 0.5, %v1012_v20  ;;  %v1024_v35 = vmul.f32 %v1757_v29, %v1006_v60  ;;  %v1021_v23 = vmul.f32 0.5, %v1759_v5 }
 0x2f9   :  { %v1023_v32 = vmul.f32 %v1013_v28, %v2395_v19  ;;  %v1022_v39 = vadd.f32 0.5, %v1021_v23 }
 0x2fb   :  { %v2434_v36 = vadd.f32 %v1024_v35, %v1023_v32 }
 0x2fd   :  { %1760 = vtanh.f32 %v2434_v36 }
 0x303   :  { %v1761_v41 = vpop.eup %1760 }
 0x304   :  { %v1027_v48 = vmul.f32 %v1761_v41, %v1022_v39 }
 0x306   :  { %v1029_v40 = vpack.c.bf16 %v1027_v48, %v1027_v48 }
 0x308   :  { %1038 = vmatmul.bf16.vlgmr.msrb.gmra.mxu0 %v1029_v40  ;;  %1051 = vmatmul.bf16.vlgmr.msrb.gmra.mxu1 %v1029_v40 }
 0x309   :  { %1064 = vmatmul.bf16.vlgmr.msrb.gmra.mxu2 %v1029_v40  ;;  %1077 = vmatmul.bf16.vlgmr.msrb.gmra.mxu3 %v1029_v40 }
 0x30a   :  { %1212 = vmatpush.bf16.msrb.mxu0 %v2034_v8  ;;  %1225 = vmatpush.bf16.msrb.mxu1 %v2036_v9 }
 0x30b   :  { %1238 = vmatpush.bf16.msrb.mxu2 %v2038_v12  ;;  %1251 = vmatpush.bf16.msrb.mxu3 %v2040_v13 }
 0x30e   :  { %1213 = vmatpush.bf16.msrb.mxu0 %v2044_v21  ;;  %1226 = vmatpush.bf16.msrb.mxu1 %v2046_v22 }
 0x30f   :  { %1239 = vmatpush.bf16.msrb.mxu2 %v2050_v25  ;;  %1252 = vmatpush.bf16.msrb.mxu3 %v2052_v26 }
 0x312   :  { %1214 = vmatpush.bf16.msrb.mxu0 %v2056_v33  ;;  %1227 = vmatpush.bf16.msrb.mxu1 %v2058_v34 }
 0x313   :  { %1240 = vmatpush.bf16.msrb.mxu2 %v2062_v37  ;;  %1253 = vmatpush.bf16.msrb.mxu3 %v2064_v38 }
 0x316   :  { %1215 = vmatpush.bf16.msrb.mxu0 %v2068_v46  ;;  %1228 = vmatpush.bf16.msrb.mxu1 %v2070_v47 }
 0x317   :  { %1241 = vmatpush.bf16.msrb.mxu2 %v2074_v50  ;;  %1254 = vmatpush.bf16.msrb.mxu3 %v2076_v51 }
 0x31a   :  { %1216 = vmatpush.bf16.msrb.mxu0 %v2080_v58  ;;  %1229 = vmatpush.bf16.msrb.mxu1 %v2082_v59 }
 0x31b   :  { %1242 = vmatpush.bf16.msrb.mxu2 %v2086_v62  ;;  %1255 = vmatpush.bf16.msrb.mxu3 %v2088_v63 }
 0x31e   :  { %1217 = vmatpush.bf16.msrb.mxu0 %v2092_v6  ;;  %1230 = vmatpush.bf16.msrb.mxu1 %v2094_v7 }
 0x31f   :  { %1243 = vmatpush.bf16.msrb.mxu2 %v2098_v14  ;;  %1256 = vmatpush.bf16.msrb.mxu3 %v2100_v15 }
 0x322   :  { %1218 = vmatpush.bf16.msrb.mxu0 %v2104_v24  ;;  %1231 = vmatpush.bf16.msrb.mxu1 %v2106_v27 }
 0x323   :  { %1244 = vmatpush.bf16.msrb.mxu2 %v2110_v30  ;;  %1257 = vmatpush.bf16.msrb.mxu3 %v2112_v31 }
 0x326   :  { %1219 = vmatpush.bf16.msrb.mxu0 %v2116_v42  ;;  %1232 = vmatpush.bf16.msrb.mxu1 %v2118_v43 }
 0x327   :  { %1245 = vmatpush.bf16.msrb.mxu2 %v2122_v44  ;;  %1258 = vmatpush.bf16.msrb.mxu3 %v2124_v45 }
 0x385   :  { %v1039_v19 = vpop.f32.mrf.mxu0  ;;  %v1052_v49 = vpop.f32.mrf.mxu1 }
 0x386   :  { %v1086_v52 = vrot.slane %v1052_v49, 6 }
 0x388   :  { %v1089_v0 = vsel %vm722_vm1, %v1039_v19, %v1086_v52 }
 0x38c   :  { %v1065_v53 = vpop.f32.mrf.mxu2  ;;  %v1078_v54 = vpop.f32.mrf.mxu3 }
 0x38d   :  { %v1087_v55 = vrot.slane %v1065_v53, 4  ;;  %v1088_v56 = vrot.slane %v1078_v54, 2  ;;  %v1041_v57 = vpop.f32.mrf.mxu0  ;;  %v1054_v61 = vpop.f32.mrf.mxu1 }
 0x38f   :  { %v1090_v1 = vsel %vm724_vm2, %v1087_v55, %v1088_v56 }
 0x390   :  { %v1091_v3 = vsel %vm726_vm3, %v1089_v0, %v1090_v1 }
 0x391   :  { %v1093_v4 = vadd.f32 %v1091_v3, %v1028_v2 }
 0x393   :  { %v1094_v10 = vmul.f32 0.5, %v1093_v4  ;;  %v1099_v11 = vrot.slane %v1093_v4, 2  ;;  %v1108_v60 = vrot.slane %v1093_v4, 6  ;;  %v1105_v20 = vrot.slane %v1093_v4, 4 }
 0x394   :  { %v1067_v16 = vpop.f32.mrf.mxu2  ;;  %v1080_v17 = vpop.f32.mrf.mxu3 }
 0x395   :  { %1762 = vtanh.f32 %v1094_v10  ;;  %v1101_v18 = vmul.f32 0.5, %v1099_v11  ;;  %v1110_v28 = vmul.f32 0.5, %v1108_v60 }
 0x397   :  { %1764 = vtanh.f32 %v1101_v18 }
 0x398   :  { %1766 = vtanh.f32 %v1105_v20 }
 0x399   :  { %1768 = vtanh.f32 %v1110_v28 }
 0x39b   :  { %v1763_v29 = vpop.eup %1762 }
 0x39c   :  { %v1096_v32 = vmul.f32 0.5, %v1763_v29 }
 0x39d   :  { %v1765_v35 = vpop.eup %1764 }
 0x39e   :  { %v1097_v5 = vadd.f32 0.5, %v1096_v32  ;;  %v1103_v23 = vmul.f32 0.5, %v1765_v35  ;;  %v1767_v41 = vpop.eup %1766  ;;  %v1210_v32 = vld [vmem:[#allocation3 + $0x30] sm:$0xff] }
 0x39f   :  { %v1769_v19 = vpop.eup %1768 }
 0x3a0   :  { %v1104_v39 = vadd.f32 0.5, %v1103_v23  ;;  %v1115_v40 = vmul.f32 %v1767_v41, %v1097_v5  ;;  %v1112_v52 = vmul.f32 0.5, %v1769_v19 }
 0x3a2   :  { %v1114_v48 = vmul.f32 %v1104_v39, %v2434_v36  ;;  %v1113_v53 = vadd.f32 0.5, %v1112_v52 }
 0x3a4   :  { %v2473_v49 = vadd.f32 %v1115_v40, %v1114_v48 }
 0x3a6   :  { %1770 = vtanh.f32 %v2473_v49 }
 0x3ac   :  { %v1771_v54 = vpop.eup %1770 }
 0x3ad   :  { %v1118_v55 = vmul.f32 %v1771_v54, %v1113_v53 }
 0x3af   :  { %v1120_v56 = vpack.c.bf16 %v1118_v55, %v1118_v55 }
 0x3b1   :  { %1129 = vmatmul.bf16.vlgmr.msra.gmra.mxu0 %v1120_v56  ;;  %1142 = vmatmul.bf16.vlgmr.msra.gmra.mxu1 %v1120_v56 }
 0x3b2   :  { %1155 = vmatmul.bf16.vlgmr.msra.gmra.mxu2 %v1120_v56  ;;  %1168 = vmatmul.bf16.vlgmr.msra.gmra.mxu3 %v1120_v56 }
 0x3b3   :  { %1303 = vmatpush.bf16.msra.mxu0 %v2034_v8  ;;  %1316 = vmatpush.bf16.msra.mxu1 %v2036_v9 }
 0x3b4   :  { %1329 = vmatpush.bf16.msra.mxu2 %v2038_v12  ;;  %1342 = vmatpush.bf16.msra.mxu3 %v2040_v13 }
 0x3b7   :  { %1304 = vmatpush.bf16.msra.mxu0 %v2044_v21  ;;  %1317 = vmatpush.bf16.msra.mxu1 %v2046_v22 }
 0x3b8   :  { %1330 = vmatpush.bf16.msra.mxu2 %v2050_v25  ;;  %1343 = vmatpush.bf16.msra.mxu3 %v2052_v26 }
 0x3bb   :  { %1305 = vmatpush.bf16.msra.mxu0 %v2056_v33  ;;  %1318 = vmatpush.bf16.msra.mxu1 %v2058_v34 }
 0x3bc   :  { %1331 = vmatpush.bf16.msra.mxu2 %v2062_v37  ;;  %1344 = vmatpush.bf16.msra.mxu3 %v2064_v38  ;;  %v1119_v38 = vld [vmem:[#allocation3 + $0x28] sm:$0xff] }
 0x3bf   :  { %1306 = vmatpush.bf16.msra.mxu0 %v2068_v46  ;;  %1319 = vmatpush.bf16.msra.mxu1 %v2070_v47 }
 0x3c0   :  { %1332 = vmatpush.bf16.msra.mxu2 %v2074_v50  ;;  %1345 = vmatpush.bf16.msra.mxu3 %v2076_v51 }
 0x3c3   :  { %1307 = vmatpush.bf16.msra.mxu0 %v2080_v58  ;;  %1320 = vmatpush.bf16.msra.mxu1 %v2082_v59 }
 0x3c4   :  { %1333 = vmatpush.bf16.msra.mxu2 %v2086_v62  ;;  %1346 = vmatpush.bf16.msra.mxu3 %v2088_v63 }
 0x3c7   :  { %1308 = vmatpush.bf16.msra.mxu0 %v2092_v6  ;;  %1321 = vmatpush.bf16.msra.mxu1 %v2094_v7 }
 0x3c8   :  { %1334 = vmatpush.bf16.msra.mxu2 %v2098_v14  ;;  %1347 = vmatpush.bf16.msra.mxu3 %v2100_v15 }
 0x3cb   :  { %1309 = vmatpush.bf16.msra.mxu0 %v2104_v24  ;;  %1322 = vmatpush.bf16.msra.mxu1 %v2106_v27 }
 0x3cc   :  { %1335 = vmatpush.bf16.msra.mxu2 %v2110_v30  ;;  %1348 = vmatpush.bf16.msra.mxu3 %v2112_v31 }
 0x3cf   :  { %1310 = vmatpush.bf16.msra.mxu0 %v2116_v42  ;;  %1323 = vmatpush.bf16.msra.mxu1 %v2118_v43 }
 0x3d0   :  { %1336 = vmatpush.bf16.msra.mxu2 %v2122_v44  ;;  %1349 = vmatpush.bf16.msra.mxu3 %v2124_v45 }
 0x42e   :  { %v1130_v8 = vpop.f32.mrf.mxu0  ;;  %v1143_v9 = vpop.f32.mrf.mxu1 }
 0x42f   :  { %v1177_v12 = vrot.slane %v1143_v9, 6 }
 0x431   :  { %v1180_v34 = vsel %vm722_vm1, %v1130_v8, %v1177_v12 }
 0x435   :  { %v1156_v13 = vpop.f32.mrf.mxu2  ;;  %v1169_v21 = vpop.f32.mrf.mxu3 }
 0x436   :  { %v1178_v22 = vrot.slane %v1156_v13, 4  ;;  %v1179_v25 = vrot.slane %v1169_v21, 2  ;;  %v1132_v26 = vpop.f32.mrf.mxu0  ;;  %v1145_v33 = vpop.f32.mrf.mxu1 }
 0x438   :  { %v1181_v37 = vsel %vm724_vm2, %v1178_v22, %v1179_v25 }
 0x439   :  { %v1182_v46 = vsel %vm726_vm3, %v1180_v34, %v1181_v37 }
 0x43a   :  { %v1184_v47 = vadd.f32 %v1182_v46, %v1119_v38 }
 0x43c   :  { %v1185_v50 = vmul.f32 0.5, %v1184_v47  ;;  %v1190_v51 = vrot.slane %v1184_v47, 2  ;;  %v1199_v63 = vrot.slane %v1184_v47, 6  ;;  %v1196_v6 = vrot.slane %v1184_v47, 4 }
 0x43d   :  { %v1158_v58 = vpop.f32.mrf.mxu2  ;;  %v1171_v59 = vpop.f32.mrf.mxu3 }
 0x43e   :  { %1772 = vtanh.f32 %v1185_v50  ;;  %v1192_v62 = vmul.f32 0.5, %v1190_v51  ;;  %v1201_v7 = vmul.f32 0.5, %v1199_v63 }
 0x440   :  { %1774 = vtanh.f32 %v1192_v62 }
 0x441   :  { %1776 = vtanh.f32 %v1196_v6 }
 0x442   :  { %1778 = vtanh.f32 %v1201_v7 }
 0x444   :  { %v1773_v14 = vpop.eup %1772 }
 0x445   :  { %v1187_v15 = vmul.f32 0.5, %v1773_v14 }
 0x446   :  { %v1775_v24 = vpop.eup %1774 }
 0x447   :  { %v1188_v27 = vadd.f32 0.5, %v1187_v15  ;;  %v1194_v30 = vmul.f32 0.5, %v1775_v24  ;;  %v1777_v42 = vpop.eup %1776  ;;  %v1301_v15 = vld [vmem:[#allocation3 + $0x38] sm:$0xff] }
 0x448   :  { %v1779_v45 = vpop.eup %1778 }
 0x449   :  { %v1195_v31 = vadd.f32 0.5, %v1194_v30  ;;  %v1206_v44 = vmul.f32 %v1777_v42, %v1188_v27  ;;  %v1203_v57 = vmul.f32 0.5, %v1779_v45 }
 0x44b   :  { %v1205_v43 = vmul.f32 %v1195_v31, %v2473_v49  ;;  %v1204_v61 = vadd.f32 0.5, %v1203_v57 }
 0x44d   :  { %v1207_v36 = vadd.f32 %v1206_v44, %v1205_v43 }
 0x44f   :  { %1780 = vtanh.f32 %v1207_v36 }
 0x455   :  { %v1781_v0 = vpop.eup %1780 }
 0x456   :  { %v1209_v1 = vmul.f32 %v1781_v0, %v1204_v61 }
 0x458   :  { %v1211_v2 = vpack.c.bf16 %v1209_v1, %v1209_v1 }
 0x45a   :  { %1220 = vmatmul.bf16.vlgmr.msrb.gmra.mxu0 %v1211_v2  ;;  %1233 = vmatmul.bf16.vlgmr.msrb.gmra.mxu1 %v1211_v2 }
 0x45b   :  { %1246 = vmatmul.bf16.vlgmr.msrb.gmra.mxu2 %v1211_v2  ;;  %1259 = vmatmul.bf16.vlgmr.msrb.gmra.mxu3 %v1211_v2 }
 0x4d7   :  { %v1221_v3 = vpop.f32.mrf.mxu0  ;;  %v1234_v4 = vpop.f32.mrf.mxu1 }
 0x4d8   :  { %v1268_v10 = vrot.slane %v1234_v4, 6 }
 0x4da   :  { %v1271_v28 = vsel %vm722_vm1, %v1221_v3, %v1268_v10 }
 0x4de   :  { %v1247_v11 = vpop.f32.mrf.mxu2  ;;  %v1260_v16 = vpop.f32.mrf.mxu3 }
 0x4df   :  { %v1269_v17 = vrot.slane %v1247_v11, 4  ;;  %v1270_v18 = vrot.slane %v1260_v16, 2  ;;  %v1223_v60 = vpop.f32.mrf.mxu0  ;;  %v1236_v20 = vpop.f32.mrf.mxu1 }
 0x4e1   :  { %v1272_v29 = vsel %vm724_vm2, %v1269_v17, %v1270_v18 }
 0x4e2   :  { %v1273_v35 = vsel %vm726_vm3, %v1271_v28, %v1272_v29 }
 0x4e3   :  { %v1275_v5 = vadd.f32 %v1273_v35, %v1210_v32 }
 0x4e5   :  { %v1276_v23 = vmul.f32 0.5, %v1275_v5  ;;  %v1281_v39 = vrot.slane %v1275_v5, 2  ;;  %v1290_v19 = vrot.slane %v1275_v5, 6  ;;  %v1287_v49 = vrot.slane %v1275_v5, 4 }
 0x4e6   :  { %v1249_v41 = vpop.f32.mrf.mxu2  ;;  %v1262_v48 = vpop.f32.mrf.mxu3 }
 0x4e7   :  { %1782 = vtanh.f32 %v1276_v23  ;;  %v1283_v40 = vmul.f32 0.5, %v1281_v39  ;;  %v1292_v52 = vmul.f32 0.5, %v1290_v19 }
 0x4e9   :  { %1784 = vtanh.f32 %v1283_v40 }
 0x4ea   :  { %1786 = vtanh.f32 %v1287_v49 }
 0x4eb   :  { %1788 = vtanh.f32 %v1292_v52 }
 0x4ed   :  { %v1783_v53 = vpop.eup %1782 }
 0x4ee   :  { %v1278_v54 = vmul.f32 0.5, %v1783_v53 }
 0x4ef   :  { %v1785_v55 = vpop.eup %1784 }
 0x4f0   :  { %v1279_v56 = vadd.f32 0.5, %v1278_v54  ;;  %v1285_v8 = vmul.f32 0.5, %v1785_v55  ;;  %v1787_v12 = vpop.eup %1786 }
 0x4f1   :  { %v1789_v22 = vpop.eup %1788 }
 0x4f2   :  { %v1286_v9 = vadd.f32 0.5, %v1285_v8  ;;  %v1297_v21 = vmul.f32 %v1787_v12, %v1279_v56  ;;  %v1294_v26 = vmul.f32 0.5, %v1789_v22 }
 0x4f4   :  { %v1296_v13 = vmul.f32 %v1286_v9, %v1207_v36  ;;  %v1295_v33 = vadd.f32 0.5, %v1294_v26 }
 0x4f6   :  { %v1298_v25 = vadd.f32 %v1297_v21, %v1296_v13 }
 0x4f8   :  { %1790 = vtanh.f32 %v1298_v25 }
 0x4fe   :  { %v1791_v34 = vpop.eup %1790 }
 0x4ff   :  { %v1300_v37 = vmul.f32 %v1791_v34, %v1295_v33 }
 0x501   :  { %v1302_v38 = vpack.c.bf16 %v1300_v37, %v1300_v37 }
 0x503   :  { %1311 = vmatmul.bf16.vlgmr.msra.gmra.mxu0 %v1302_v38  ;;  %1324 = vmatmul.bf16.vlgmr.msra.gmra.mxu1 %v1302_v38 }
 0x504   :  { %1337 = vmatmul.bf16.vlgmr.msra.gmra.mxu2 %v1302_v38  ;;  %1350 = vmatmul.bf16.vlgmr.msra.gmra.mxu3 %v1302_v38 }
 0x580   :  { %v1312_v46 = vpop.f32.mrf.mxu0  ;;  %v1325_v47 = vpop.f32.mrf.mxu1 }
 0x581   :  { %v1359_v50 = vrot.slane %v1325_v47, 6 }
 0x583   :  { %v1362_v7 = vsel %vm722_vm1, %v1312_v46, %v1359_v50 }
 0x587   :  { %v1338_v51 = vpop.f32.mrf.mxu2  ;;  %v1351_v58 = vpop.f32.mrf.mxu3 }
 0x588   :  { %v1360_v59 = vrot.slane %v1338_v51, 4  ;;  %v1361_v62 = vrot.slane %v1351_v58, 2  ;;  %v1314_v63 = vpop.f32.mrf.mxu0  ;;  %v1327_v6 = vpop.f32.mrf.mxu1 }
 0x58a   :  { %v1363_v14 = vsel %vm724_vm2, %v1360_v59, %v1361_v62 }
 0x58b   :  { %v1364_v24 = vsel %vm726_vm3, %v1362_v7, %v1363_v14 }
 0x58c   :  { %v1366_v27 = vadd.f32 %v1364_v24, %v1301_v15 }
 0x58e   :  { %v1367_v30 = vmul.f32 0.5, %v1366_v27  ;;  %v1372_v31 = vrot.slane %v1366_v27, 2  ;;  %v1381_v45 = vrot.slane %v1366_v27, 6  ;;  %v1378_v36 = vrot.slane %v1366_v27, 4 }
 0x58f   :  { %v1340_v42 = vpop.f32.mrf.mxu2  ;;  %v1353_v43 = vpop.f32.mrf.mxu3 }
 0x590   :  { %1792 = vtanh.f32 %v1367_v30  ;;  %v1374_v44 = vmul.f32 0.5, %v1372_v31  ;;  %v1383_v57 = vmul.f32 0.5, %v1381_v45 }
 0x592   :  { %1794 = vtanh.f32 %v1374_v44 }
 0x593   :  { %1796 = vtanh.f32 %v1378_v36 }
 0x594   :  { %1798 = vtanh.f32 %v1383_v57 }
 0x596   :  { %v1793_v61 = vpop.eup %1792 }
 0x597   :  { %v1369_v0 = vmul.f32 0.5, %v1793_v61 }
 0x598   :  { %v1795_v1 = vpop.eup %1794 }
 0x599   :  { %v1370_v2 = vadd.f32 0.5, %v1369_v0  ;;  %v1376_v3 = vmul.f32 0.5, %v1795_v1  ;;  %v1797_v10 = vpop.eup %1796 }
 0x59a   :  { %v1799_v17 = vpop.eup %1798 }
 0x59b   :  { %v1377_v4 = vadd.f32 0.5, %v1376_v3  ;;  %v1388_v16 = vmul.f32 %v1797_v10, %v1370_v2  ;;  %v1385_v60 = vmul.f32 0.5, %v1799_v17 }
 0x59d   :  { %v1387_v11 = vmul.f32 %v1377_v4, %v1298_v25  ;;  %v1386_v20 = vadd.f32 0.5, %v1385_v60 }
 0x59f   :  { %v1389_v18 = vadd.f32 %v1388_v16, %v1387_v11 }
 0x5a1   :  { %1800 = vtanh.f32 %v1389_v18  ;;  %1393 = vst [vmem:[#allocation15] sm:$0x3] %v1389_v18 }
 0x5a2   :  { %1415 = dma.vmem_to_hbm [thread:$0]  %s1411_s13, 32, %s1413_s16, [#allocation16]  }
 0x5a7   :  { %v1801_v28 = vpop.eup %1800 }
 0x5a8   :  { %v1391_v29 = vmul.f32 %v1801_v28, %v1386_v20 }
 0x5aa   :  { %1392 = vst [vmem:[#allocation14] sm:$0x3] %v1391_v29 }
 0x5ab   :  { %1404 = dma.vmem_to_hbm [thread:$0]  %s1400_s9, 32, %s1402_s21, [#allocation6]  }
 0x5ac   :  { %1966 = dma.done.wait [#allocation6], 32  }
 0x5ad   :  { %1967 = vsyncadd [#allocation6], 4294967264 }
 0x5ae   :  { %1968 = dma.done.wait [#allocation16], 32  }
 0x5af   :  { %1969 = vsyncadd [#allocation16], 4294967264 }
 0x5b0   :  { %1424 = vsyncpa [#allocation5], 1 }
 0x5b1   :  { %1425 = vsyncpa [#allocation10], 1 }
 0x5b2   :  { %1426 = vsyncpa [#allocation13], 1 }
 0x5b3   :  { %1427 = vsyncpa [#allocation6], 1 }
 0x5b4   :  { %1428 = vsyncpa [#allocation16], 1 }
 0x5b5   :  { %1429 = vsyncpa [#allocation7], 1 }

</bundles_post_ra>
